<compile_context>
chip_gen: v6e
topology: v6e:2x2x1
jax: 0.10.0
libtpu: 0.0.40
codegen_flags: <defaults>
</compile_context>

<pallas_src>
import jax
import jax.numpy as jnp
import numpy as np
from jax.experimental import pallas as pl
from jax.experimental.pallas import tpu as pltpu


# ---------------------------------------------------------------------------
# Fused kernel: one grid step == one block of B_blk batch elements.
# ---------------------------------------------------------------------------
def _deform_conv_kernel(ximgT_ref, xflat_ref, woff_ref, wreg_ref, b_ref,
                        gh_ref, gw_ref, mask_ref, o_ref, s_ref):
    f32 = jnp.float32
    Bb, C, Wd, Hd = ximgT_ref.shape          # image block, stored (C, W, H)
    HWp = xflat_ref.shape[-1]                # lane-padded H*W (mult. of 128)

    w_off = woff_ref[...]                    # (2C, 9C)
    w_reg = wreg_ref[...]                    # (Cout, 9C)
    bias = b_ref[...]                        # (Cout, 1)
    gh = gh_ref[...]                         # (1, HWp) flattened grid_h
    gw = gw_ref[...]                         # (1, HWp) flattened grid_w

    def conv3x3(v, w2d):
        # 3x3 "same" conv of flat planes v:(C,HWp) with w2d:(Co,9C).
        # Taps via pltpu.roll (XLU) + precomputed boundary masks; weight
        # column order is (kh, kw, cin), matching tap order t=(dh+1)*3+(dw+1).
        use_im2col = C < 32
        acc = None
        t = 0
        for dh in (-1, 0, 1):
            for dw in (-1, 0, 1):
                d = dh * Wd + dw
                if d == 0:
                    tap = v
                else:
                    tap = pltpu.roll(v, (-d) % HWp, 1) * mask_ref[t]
                if use_im2col:
                    # Small C: im2col into VMEM scratch -> ONE fat matmul.
                    s_ref[t * C:(t + 1) * C, :] = tap
                else:
                    # Large C: accumulate 9 (Co,C)@(C,HWp) matmuls, no im2col
                    # store/reload pass (saves the vector-store slot).
                    part = jnp.dot(w2d[:, t * C:(t + 1) * C], tap,
                                   preferred_element_type=f32)
                    acc = part if acc is None else acc + part
                t += 1
        if use_im2col:
            return jnp.dot(w2d, s_ref[...], preferred_element_type=f32)
        return acc

    # Float row/col iotas for the tent weights (hoisted out of the b loop;
    # int iota + convert avoids relying on float-iota lowering).
    hi = jax.lax.broadcasted_iota(jnp.int32, (1, Hd, HWp), 1).astype(f32)
    wi = jax.lax.broadcasted_iota(jnp.int32, (1, Wd, HWp), 1).astype(f32)

    for b in range(Bb):
        xf = xflat_ref[b]                                   # (C, HWp)

        # ---- offset conv: C -> 2C, 3x3, padding 1, no bias ------------------
        off = conv3x3(xf, w_off)                            # (2C, HWp)
        # torch.split order: first C channels = offset_w, last C = offset_h;
        # grid[..., 0] = offset_h -> x coordinate, grid[..., 1] = offset_w -> y.
        gx = off[C:2 * C, :] + gh
        gy = off[0:C, :] + gw

        # ---- bilinear grid_sample (align_corners=False, zeros padding) ------
        ix = (gx + 1.0) * (0.5 * Wd) - 0.5                  # (C, HWp)
        iy = (gy + 1.0) * (0.5 * Hd) - 0.5
        # Tent weights == exact bilinear weights; out-of-range taps get 0.
        sel_y = jnp.maximum(0.0, 1.0 - jnp.abs(hi - iy[:, None, :]))  # (C,H,HWp)
        sel_x = jnp.maximum(0.0, 1.0 - jnp.abs(wi - ix[:, None, :]))  # (C,W,HWp)

        imgT = ximgT_ref[b]                                 # (C, W, H)
        # Row gather on the MXU, batched over channels; HWp stays on lanes:
        #   rowmix[c, w, p] = sum_h imgT[c, w, h] * sel_y[c, h, p]
        rowmix = jax.lax.dot_general(
            imgT, sel_y,
            dimension_numbers=(((2,), (1,)), ((0,), (0,))),
            preferred_element_type=f32)                     # (C, W, HWp)
        # Column interpolation: elementwise mul + cheap sublane-axis reduce.
        sampled = jnp.sum(sel_x * rowmix, axis=1)           # (C, HWp)

        # ---- regular conv: C -> Cout, 3x3, padding 1, bias; lane-dense ------
        o_ref[b] = conv3x3(sampled, w_reg) + bias


# ---------------------------------------------------------------------------
# Wrapper: one pallas_call for the whole forward pass.
# ---------------------------------------------------------------------------
def _pick_batch_block(n):
    # Keep >=2 grid steps (even when possible) so v7x's two TensorCores both
    # get work under dimension_semantics=("parallel",).
    for b in (8, 4, 2):
        if n % b == 0 and n // b >= 2:
            return b
    return 1


def conv2d_deformable_forward(x, offset_weight, reg_weight, reg_bias):
    # x: (N, C, H, W); offset_weight: (2C, C, 3, 3) OIHW (no bias);
    # reg_weight: (Cout, C, 3, 3) OIHW; reg_bias: (Cout,)
    N, C, H, W = x.shape
    Cout = reg_weight.shape[0]
    HW = H * W
    HWp = ((HW + 127) // 128) * 128          # lane-dense flattened pixel axis

    x = x.astype(jnp.float32)
    x_flat = x.reshape(N, C, HW)
    if HWp != HW:
        x_flat = jnp.pad(x_flat, ((0, 0), (0, 0), (0, HWp - HW)))
    x_t = jnp.swapaxes(x, 2, 3)              # (N, C, W, H): canonical MXU lhs

    # Matmul-ready 2-D weights; column order (kh, kw, cin) == in-kernel taps.
    w_off2d = jnp.transpose(offset_weight.astype(jnp.float32),
                            (0, 2, 3, 1)).reshape(2 * C, 9 * C)
    w_reg2d = jnp.transpose(reg_weight.astype(jnp.float32),
                            (0, 2, 3, 1)).reshape(Cout, 9 * C)
    b2d = reg_bias.astype(jnp.float32).reshape(Cout, 1)

    # Flattened base sampling grids: np.meshgrid(linspace(-1,1,W),
    # linspace(-1,1,H)) with default 'xy' indexing, zero-padded to HWp.
    lin_h = jnp.linspace(-1.0, 1.0, H, dtype=jnp.float32)
    lin_w = jnp.linspace(-1.0, 1.0, W, dtype=jnp.float32)
    grid_h = jnp.broadcast_to(lin_h[:, None], (H, W)).reshape(1, HW)
    grid_w = jnp.broadcast_to(lin_w[None, :], (H, W)).reshape(1, HW)
    if HWp != HW:
        grid_h = jnp.pad(grid_h, ((0, 0), (0, HWp - HW)))
        grid_w = jnp.pad(grid_w, ((0, 0), (0, HWp - HW)))

    # Per-tap validity masks ("same" padding + kill padded lanes); tap order
    # t = (dh+1)*3 + (dw+1) matches the kernel's roll loop.
    p_idx = np.arange(HWp)
    row_idx, col_idx = p_idx // W, p_idx % W
    in_img = p_idx < HW
    masks_np = np.zeros((9, HWp), np.float32)
    t = 0
    for dh in (-1, 0, 1):
        rm = np.ones(HWp, bool) if dh == 0 else (row_idx != (0 if dh < 0 else H - 1))
        for dw in (-1, 0, 1):
            cm = np.ones(HWp, bool) if dw == 0 else (col_idx != (0 if dw < 0 else W - 1))
            masks_np[t] = (rm & cm & in_img).astype(np.float32)
            t += 1
    tap_masks = jnp.asarray(masks_np).reshape(9, 1, HWp)

    B_blk = _pick_batch_block(N)
    grid = (N // B_blk,)
    scratch = [pltpu.VMEM((9 * C, HWp) if C < 32 else (8, 128), jnp.float32)]

    out_flat = pl.pallas_call(
        _deform_conv_kernel,
        out_shape=jax.ShapeDtypeStruct((N, Cout, HWp), jnp.float32),
        grid=grid,
        in_specs=[
            pl.BlockSpec((B_blk, C, W, H), lambda i: (i, 0, 0, 0)),    # x^T image
            pl.BlockSpec((B_blk, C, HWp), lambda i: (i, 0, 0)),        # x flat
            pl.BlockSpec((2 * C, 9 * C), lambda i: (0, 0)),            # offset conv W
            pl.BlockSpec((Cout, 9 * C), lambda i: (0, 0)),             # regular conv W
            pl.BlockSpec((Cout, 1), lambda i: (0, 0)),                 # regular conv b
            pl.BlockSpec((1, HWp), lambda i: (0, 0)),                  # grid_h (flat)
            pl.BlockSpec((1, HWp), lambda i: (0, 0)),                  # grid_w (flat)
            pl.BlockSpec((9, 1, HWp), lambda i: (0, 0, 0)),            # tap masks
        ],
        out_specs=pl.BlockSpec((B_blk, Cout, HWp), lambda i: (i, 0, 0)),
        scratch_shapes=scratch,
        compiler_params=pltpu.CompilerParams(
            dimension_semantics=("parallel",),
            vmem_limit_bytes=32 * 1024 * 1024,
        ),
    )(x_t, x_flat, w_off2d, w_reg2d, b2d, grid_h, grid_w, tap_masks)

    return out_flat[:, :, :HW].reshape(N, Cout, H, W)       # NCHW, free reshape


# ---------------------------------------------------------------------------
# Pure-JAX reference (correctness check only).
# ---------------------------------------------------------------------------
def _ref_sample_plane(im, gx, gy):
    H, W = im.shape
    ix = ((gx + 1.0) * W - 1.0) * 0.5
    iy = ((gy + 1.0) * H - 1.0) * 0.5
    x0 = jnp.floor(ix)
    y0 = jnp.floor(iy)
    wx1 = ix - x0
    wx0 = 1.0 - wx1
    wy1 = iy - y0
    wy0 = 1.0 - wy1

    def tap(yf, xf, w):
        yi = yf.astype(jnp.int32)
        xi = xf.astype(jnp.int32)
        valid = ((yi >= 0) & (yi < H) & (xi >= 0) & (xi < W)).astype(im.dtype)
        yc = jnp.clip(yi, 0, H - 1)
        xc = jnp.clip(xi, 0, W - 1)
        return w * valid * im[yc, xc]

    return (tap(y0, x0, wy0 * wx0) + tap(y0, x0 + 1, wy0 * wx1)
            + tap(y0 + 1, x0, wy1 * wx0) + tap(y0 + 1, x0 + 1, wy1 * wx1))


def reference_forward(x, offset_weight, reg_weight, reg_bias):
    N, C, H, W = x.shape
    hp = jax.lax.Precision.HIGHEST
    off = jax.lax.conv_general_dilated(
        x, offset_weight, (1, 1), ((1, 1), (1, 1)),
        dimension_numbers=("NCHW", "OIHW", "NCHW"), precision=hp)
    offset_w = off[:, :C].reshape(N * C, H, W)
    offset_h = off[:, C:].reshape(N * C, H, W)
    grid_w = jnp.broadcast_to(
        jnp.linspace(-1.0, 1.0, W, dtype=jnp.float32)[None, :], (H, W))
    grid_h = jnp.broadcast_to(
        jnp.linspace(-1.0, 1.0, H, dtype=jnp.float32)[:, None], (H, W))
    gx = offset_h + grid_h[None]
    gy = offset_w + grid_w[None]
    sampled = jax.vmap(_ref_sample_plane)(x.reshape(N * C, H, W), gx, gy)
    x2 = sampled.reshape(N, C, H, W)
    y = jax.lax.conv_general_dilated(
        x2, reg_weight, (1, 1), ((1, 1), (1, 1)),
        dimension_numbers=("NCHW", "OIHW", "NCHW"), precision=hp)
    return y + reg_bias[None, :, None, None]


if __name__ == "__main__":
    key = jax.random.PRNGKey(0)
    N, C, H, W = 2, 4, 16, 16
    Cout = 8
    k1, k2, k3, k4 = jax.random.split(key, 4)

    x = jax.random.normal(k1, (N, C, H, W), jnp.float32)
    # offset_filter: Conv2d(C, 2C, 3, padding=1, bias=False), weight ~ N(0, 0.0005)
    offset_weight = jax.random.normal(k2, (2 * C, C, 3, 3), jnp.float32) * 0.0005
    # regular_filter: Conv2d(C, Cout, 3, padding=1, bias=True)
    reg_weight = jax.random.normal(k3, (Cout, C, 3, 3), jnp.float32) * 0.1
    reg_bias = jax.random.normal(k4, (Cout,), jnp.float32) * 0.1

    fwd = jax.jit(conv2d_deformable_forward)
    out = jax.block_until_ready(fwd(x, offset_weight, reg_weight, reg_bias))

    ref = reference_forward(x, offset_weight, reg_weight, reg_bias)
    np.testing.assert_allclose(np.asarray(out), np.asarray(ref),
                               atol=5e-3, rtol=5e-3)
    assert out.shape == (N, Cout, H, W)
    print("KERNEL_OK")
</pallas_src>

<mosaic_0001>
module attributes {stable_mosaic.version = 11 : i64} {
  func.func @_deform_conv_kernel(%arg0: i32, %arg1: memref<1x4x16x16xf32, #tpu.memory_space<vmem>>, %arg2: memref<1x4x256xf32, #tpu.memory_space<vmem>>, %arg3: memref<8x36xf32, #tpu.memory_space<vmem>>, %arg4: memref<8x36xf32, #tpu.memory_space<vmem>>, %arg5: memref<8x1xf32, #tpu.memory_space<vmem>>, %arg6: memref<1x256xf32, #tpu.memory_space<vmem>>, %arg7: memref<1x256xf32, #tpu.memory_space<vmem>>, %arg8: memref<9x1x256xf32, #tpu.memory_space<vmem>>, %arg9: memref<1x8x256xf32, #tpu.memory_space<vmem>>, %arg10: memref<36x256xf32, #tpu.memory_space<vmem>>) attributes {dimension_semantics = [#tpu.dimension_semantics<parallel>], iteration_bounds = array<i64: 2>, scalar_prefetch = 0 : i64, scratch_operands = 1 : i64, tpu.core_type = #tpu.core_type<tc>, window_params = [{transform_indices = @transform_0, window_bounds = array<i64: 1, 4, 16, 16>}, {transform_indices = @transform_1, window_bounds = array<i64: 1, 4, 256>}, {pipeline_mode = #tpu.pipeline_mode<synchronous>, transform_indices = @transform_2, window_bounds = array<i64: 8, 36>}, {pipeline_mode = #tpu.pipeline_mode<synchronous>, transform_indices = @transform_3, window_bounds = array<i64: 8, 36>}, {pipeline_mode = #tpu.pipeline_mode<synchronous>, transform_indices = @transform_4, window_bounds = array<i64: 8, 1>}, {pipeline_mode = #tpu.pipeline_mode<synchronous>, transform_indices = @transform_5, window_bounds = array<i64: 1, 256>}, {pipeline_mode = #tpu.pipeline_mode<synchronous>, transform_indices = @transform_6, window_bounds = array<i64: 1, 256>}, {pipeline_mode = #tpu.pipeline_mode<synchronous>, transform_indices = @transform_7, window_bounds = array<i64: 9, 1, 256>}, {transform_indices = @transform_8, window_bounds = array<i64: 1, 8, 256>}]} {
    %c0 = arith.constant 0 : index
    %c0_0 = arith.constant 0 : index
    %0 = vector.load %arg3[%c0, %c0_0] : memref<8x36xf32, #tpu.memory_space<vmem>>, vector<8x36xf32>
    %c0_1 = arith.constant 0 : index
    %c0_2 = arith.constant 0 : index
    %1 = vector.load %arg4[%c0_1, %c0_2] : memref<8x36xf32, #tpu.memory_space<vmem>>, vector<8x36xf32>
    %c0_3 = arith.constant 0 : index
    %c0_4 = arith.constant 0 : index
    %2 = vector.load %arg5[%c0_3, %c0_4] : memref<8x1xf32, #tpu.memory_space<vmem>>, vector<8x1xf32>
    %c0_5 = arith.constant 0 : index
    %c0_6 = arith.constant 0 : index
    %3 = vector.load %arg6[%c0_5, %c0_6] : memref<1x256xf32, #tpu.memory_space<vmem>>, vector<1x256xf32>
    %c0_7 = arith.constant 0 : index
    %c0_8 = arith.constant 0 : index
    %4 = vector.load %arg7[%c0_7, %c0_8] : memref<1x256xf32, #tpu.memory_space<vmem>>, vector<1x256xf32>
    %5 = tpu.iota {dimensions = array<i32: 1>} : vector<1x16x256xi32>
    %6 = arith.sitofp %5 : vector<1x16x256xi32> to vector<1x16x256xf32>
    %7 = tpu.iota {dimensions = array<i32: 1>} : vector<1x16x256xi32>
    %8 = arith.sitofp %7 : vector<1x16x256xi32> to vector<1x16x256xf32>
    %c0_9 = arith.constant 0 : index
    %c0_10 = arith.constant 0 : index
    %c0_11 = arith.constant 0 : index
    %9 = vector.load %arg2[%c0_9, %c0_10, %c0_11] : memref<1x4x256xf32, #tpu.memory_space<vmem>>, vector<1x4x256xf32>
    %10 = vector.shape_cast %9 : vector<1x4x256xf32> to vector<4x256xf32>
    %c17_i32 = arith.constant 17 : i32
    %11 = tpu.dynamic_rotate %10 by %c17_i32 dim 1 : vector<4x256xf32>, i32 -> vector<4x256xf32>
    %c0_12 = arith.constant 0 : index
    %c0_13 = arith.constant 0 : index
    %c0_14 = arith.constant 0 : index
    %12 = vector.load %arg8[%c0_12, %c0_13, %c0_14] : memref<9x1x256xf32, #tpu.memory_space<vmem>>, vector<1x1x256xf32>
    %13 = vector.shape_cast %12 : vector<1x1x256xf32> to vector<1x256xf32>
    %14 = vector.broadcast %13 : vector<1x256xf32> to vector<4x256xf32>
    %15 = arith.mulf %11, %14 : vector<4x256xf32>
    %c0_15 = arith.constant 0 : index
    %c0_16 = arith.constant 0 : index
    %16 = vector.load %arg10[%c0_15, %c0_16] : memref<36x256xf32, #tpu.memory_space<vmem>>, vector<4x256xf32>
    tpu.vector_store %arg10[%c0_15, %c0_16], %15 {strides = array<i32>} : memref<36x256xf32, #tpu.memory_space<vmem>>, vector<4x256xf32>,
    %c16_i32 = arith.constant 16 : i32
    %17 = tpu.dynamic_rotate %10 by %c16_i32 dim 1 : vector<4x256xf32>, i32 -> vector<4x256xf32>
    %c1 = arith.constant 1 : index
    %c0_17 = arith.constant 0 : index
    %c0_18 = arith.constant 0 : index
    %18 = vector.load %arg8[%c1, %c0_17, %c0_18] : memref<9x1x256xf32, #tpu.memory_space<vmem>>, vector<1x1x256xf32>
    %19 = vector.shape_cast %18 : vector<1x1x256xf32> to vector<1x256xf32>
    %20 = vector.broadcast %19 : vector<1x256xf32> to vector<4x256xf32>
    %21 = arith.mulf %17, %20 : vector<4x256xf32>
    %c4 = arith.constant 4 : index
    %c0_19 = arith.constant 0 : index
    %22 = vector.load %arg10[%c4, %c0_19] : memref<36x256xf32, #tpu.memory_space<vmem>>, vector<4x256xf32>
    tpu.vector_store %arg10[%c4, %c0_19], %21 {strides = array<i32>} : memref<36x256xf32, #tpu.memory_space<vmem>>, vector<4x256xf32>,
    %c15_i32 = arith.constant 15 : i32
    %23 = tpu.dynamic_rotate %10 by %c15_i32 dim 1 : vector<4x256xf32>, i32 -> vector<4x256xf32>
    %c2 = arith.constant 2 : index
    %c0_20 = arith.constant 0 : index
    %c0_21 = arith.constant 0 : index
    %24 = vector.load %arg8[%c2, %c0_20, %c0_21] : memref<9x1x256xf32, #tpu.memory_space<vmem>>, vector<1x1x256xf32>
    %25 = vector.shape_cast %24 : vector<1x1x256xf32> to vector<1x256xf32>
    %26 = vector.broadcast %25 : vector<1x256xf32> to vector<4x256xf32>
    %27 = arith.mulf %23, %26 : vector<4x256xf32>
    %c8 = arith.constant 8 : index
    %c0_22 = arith.constant 0 : index
    %28 = vector.load %arg10[%c8, %c0_22] : memref<36x256xf32, #tpu.memory_space<vmem>>, vector<4x256xf32>
    tpu.vector_store %arg10[%c8, %c0_22], %27 {strides = array<i32>} : memref<36x256xf32, #tpu.memory_space<vmem>>, vector<4x256xf32>,
    %c1_i32 = arith.constant 1 : i32
    %29 = tpu.dynamic_rotate %10 by %c1_i32 dim 1 : vector<4x256xf32>, i32 -> vector<4x256xf32>
    %c3 = arith.constant 3 : index
    %c0_23 = arith.constant 0 : index
    %c0_24 = arith.constant 0 : index
    %30 = vector.load %arg8[%c3, %c0_23, %c0_24] : memref<9x1x256xf32, #tpu.memory_space<vmem>>, vector<1x1x256xf32>
    %31 = vector.shape_cast %30 : vector<1x1x256xf32> to vector<1x256xf32>
    %32 = vector.broadcast %31 : vector<1x256xf32> to vector<4x256xf32>
    %33 = arith.mulf %29, %32 : vector<4x256xf32>
    %c12 = arith.constant 12 : index
    %c0_25 = arith.constant 0 : index
    %34 = vector.load %arg10[%c12, %c0_25] : memref<36x256xf32, #tpu.memory_space<vmem>>, vector<4x256xf32>
    tpu.vector_store %arg10[%c12, %c0_25], %33 {strides = array<i32>} : memref<36x256xf32, #tpu.memory_space<vmem>>, vector<4x256xf32>,
    %c16 = arith.constant 16 : index
    %c0_26 = arith.constant 0 : index
    %35 = vector.load %arg10[%c16, %c0_26] : memref<36x256xf32, #tpu.memory_space<vmem>>, vector<4x256xf32>
    tpu.vector_store %arg10[%c16, %c0_26], %10 {strides = array<i32>} : memref<36x256xf32, #tpu.memory_space<vmem>>, vector<4x256xf32>,
    %c255_i32 = arith.constant 255 : i32
    %36 = tpu.dynamic_rotate %10 by %c255_i32 dim 1 : vector<4x256xf32>, i32 -> vector<4x256xf32>
    %c5 = arith.constant 5 : index
    %c0_27 = arith.constant 0 : index
    %c0_28 = arith.constant 0 : index
    %37 = vector.load %arg8[%c5, %c0_27, %c0_28] : memref<9x1x256xf32, #tpu.memory_space<vmem>>, vector<1x1x256xf32>
    %38 = vector.shape_cast %37 : vector<1x1x256xf32> to vector<1x256xf32>
    %39 = vector.broadcast %38 : vector<1x256xf32> to vector<4x256xf32>
    %40 = arith.mulf %36, %39 : vector<4x256xf32>
    %c20 = arith.constant 20 : index
    %c0_29 = arith.constant 0 : index
    %41 = vector.load %arg10[%c20, %c0_29] : memref<36x256xf32, #tpu.memory_space<vmem>>, vector<4x256xf32>
    tpu.vector_store %arg10[%c20, %c0_29], %40 {strides = array<i32>} : memref<36x256xf32, #tpu.memory_space<vmem>>, vector<4x256xf32>,
    %c241_i32 = arith.constant 241 : i32
    %42 = tpu.dynamic_rotate %10 by %c241_i32 dim 1 : vector<4x256xf32>, i32 -> vector<4x256xf32>
    %c6 = arith.constant 6 : index
    %c0_30 = arith.constant 0 : index
    %c0_31 = arith.constant 0 : index
    %43 = vector.load %arg8[%c6, %c0_30, %c0_31] : memref<9x1x256xf32, #tpu.memory_space<vmem>>, vector<1x1x256xf32>
    %44 = vector.shape_cast %43 : vector<1x1x256xf32> to vector<1x256xf32>
    %45 = vector.broadcast %44 : vector<1x256xf32> to vector<4x256xf32>
    %46 = arith.mulf %42, %45 : vector<4x256xf32>
    %c24 = arith.constant 24 : index
    %c0_32 = arith.constant 0 : index
    %47 = vector.load %arg10[%c24, %c0_32] : memref<36x256xf32, #tpu.memory_space<vmem>>, vector<4x256xf32>
    tpu.vector_store %arg10[%c24, %c0_32], %46 {strides = array<i32>} : memref<36x256xf32, #tpu.memory_space<vmem>>, vector<4x256xf32>,
    %c240_i32 = arith.constant 240 : i32
    %48 = tpu.dynamic_rotate %10 by %c240_i32 dim 1 : vector<4x256xf32>, i32 -> vector<4x256xf32>
    %c7 = arith.constant 7 : index
    %c0_33 = arith.constant 0 : index
    %c0_34 = arith.constant 0 : index
    %49 = vector.load %arg8[%c7, %c0_33, %c0_34] : memref<9x1x256xf32, #tpu.memory_space<vmem>>, vector<1x1x256xf32>
    %50 = vector.shape_cast %49 : vector<1x1x256xf32> to vector<1x256xf32>
    %51 = vector.broadcast %50 : vector<1x256xf32> to vector<4x256xf32>
    %52 = arith.mulf %48, %51 : vector<4x256xf32>
    %c28 = arith.constant 28 : index
    %c0_35 = arith.constant 0 : index
    %53 = vector.load %arg10[%c28, %c0_35] : memref<36x256xf32, #tpu.memory_space<vmem>>, vector<4x256xf32>
    tpu.vector_store %arg10[%c28, %c0_35], %52 {strides = array<i32>} : memref<36x256xf32, #tpu.memory_space<vmem>>, vector<4x256xf32>,
    %c239_i32 = arith.constant 239 : i32
    %54 = tpu.dynamic_rotate %10 by %c239_i32 dim 1 : vector<4x256xf32>, i32 -> vector<4x256xf32>
    %c8_36 = arith.constant 8 : index
    %c0_37 = arith.constant 0 : index
    %c0_38 = arith.constant 0 : index
    %55 = vector.load %arg8[%c8_36, %c0_37, %c0_38] : memref<9x1x256xf32, #tpu.memory_space<vmem>>, vector<1x1x256xf32>
    %56 = vector.shape_cast %55 : vector<1x1x256xf32> to vector<1x256xf32>
    %57 = vector.broadcast %56 : vector<1x256xf32> to vector<4x256xf32>
    %58 = arith.mulf %54, %57 : vector<4x256xf32>
    %c32 = arith.constant 32 : index
    %c0_39 = arith.constant 0 : index
    %59 = vector.load %arg10[%c32, %c0_39] : memref<36x256xf32, #tpu.memory_space<vmem>>, vector<4x256xf32>
    tpu.vector_store %arg10[%c32, %c0_39], %58 {strides = array<i32>} : memref<36x256xf32, #tpu.memory_space<vmem>>, vector<4x256xf32>,
    %c0_40 = arith.constant 0 : index
    %c0_41 = arith.constant 0 : index
    %60 = vector.load %arg10[%c0_40, %c0_41] : memref<36x256xf32, #tpu.memory_space<vmem>>, vector<36x256xf32>
    %cst = arith.constant dense<0.000000e+00> : vector<8x256xf32>
    %61 = tpu.matmul %0, %60, %cst {dimension_numbers = #tpu.dot_dimension_numbers<[1], [0], [0], [1], [0, 0, 1, 1], [], []>} : vector<8x36xf32>, vector<36x256xf32>, vector<8x256xf32> -> vector<8x256xf32>
    %62 = vector.extract_strided_slice %61 {offsets = [4, 0], sizes = [4, 256], strides = [1, 1]} : vector<8x256xf32> to vector<4x256xf32>
    %63 = vector.broadcast %3 : vector<1x256xf32> to vector<4x256xf32>
    %64 = arith.addf %62, %63 : vector<4x256xf32>
    %65 = vector.extract_strided_slice %61 {offsets = [0, 0], sizes = [4, 256], strides = [1, 1]} : vector<8x256xf32> to vector<4x256xf32>
    %66 = vector.broadcast %4 : vector<1x256xf32> to vector<4x256xf32>
    %67 = arith.addf %65, %66 : vector<4x256xf32>
    %cst_42 = arith.constant 1.000000e+00 : f32
    %68 = vector.broadcast %cst_42 : f32 to vector<4x256xf32>
    %69 = arith.addf %64, %68 : vector<4x256xf32>
    %cst_43 = arith.constant 8.000000e+00 : f32
    %70 = vector.broadcast %cst_43 : f32 to vector<4x256xf32>
    %71 = arith.mulf %69, %70 : vector<4x256xf32>
    %cst_44 = arith.constant 5.000000e-01 : f32
    %72 = vector.broadcast %cst_44 : f32 to vector<4x256xf32>
    %73 = arith.subf %71, %72 : vector<4x256xf32>
    %cst_45 = arith.constant 1.000000e+00 : f32
    %74 = vector.broadcast %cst_45 : f32 to vector<4x256xf32>
    %75 = arith.addf %67, %74 : vector<4x256xf32>
    %cst_46 = arith.constant 8.000000e+00 : f32
    %76 = vector.broadcast %cst_46 : f32 to vector<4x256xf32>
    %77 = arith.mulf %75, %76 : vector<4x256xf32>
    %cst_47 = arith.constant 5.000000e-01 : f32
    %78 = vector.broadcast %cst_47 : f32 to vector<4x256xf32>
    %79 = arith.subf %77, %78 : vector<4x256xf32>
    %80 = vector.shape_cast %79 : vector<4x256xf32> to vector<4x1x256xf32>
    %81 = vector.broadcast %6 : vector<1x16x256xf32> to vector<4x16x256xf32>
    %82 = vector.broadcast %80 : vector<4x1x256xf32> to vector<4x16x256xf32>
    %83 = arith.subf %81, %82 : vector<4x16x256xf32>
    %84 = math.absf %83 : vector<4x16x256xf32>
    %cst_48 = arith.constant 1.000000e+00 : f32
    %85 = vector.broadcast %cst_48 : f32 to vector<4x16x256xf32>
    %86 = arith.subf %85, %84 : vector<4x16x256xf32>
    %cst_49 = arith.constant 0.000000e+00 : f32
    %87 = vector.broadcast %cst_49 : f32 to vector<4x16x256xf32>
    %88 = arith.maximumf %87, %86 : vector<4x16x256xf32>
    %89 = vector.shape_cast %73 : vector<4x256xf32> to vector<4x1x256xf32>
    %90 = vector.broadcast %8 : vector<1x16x256xf32> to vector<4x16x256xf32>
    %91 = vector.broadcast %89 : vector<4x1x256xf32> to vector<4x16x256xf32>
    %92 = arith.subf %90, %91 : vector<4x16x256xf32>
    %93 = math.absf %92 : vector<4x16x256xf32>
    %cst_50 = arith.constant 1.000000e+00 : f32
    %94 = vector.broadcast %cst_50 : f32 to vector<4x16x256xf32>
    %95 = arith.subf %94, %93 : vector<4x16x256xf32>
    %cst_51 = arith.constant 0.000000e+00 : f32
    %96 = vector.broadcast %cst_51 : f32 to vector<4x16x256xf32>
    %97 = arith.maximumf %96, %95 : vector<4x16x256xf32>
    %c0_52 = arith.constant 0 : index
    %c0_53 = arith.constant 0 : index
    %c0_54 = arith.constant 0 : index
    %c0_55 = arith.constant 0 : index
    %98 = vector.load %arg1[%c0_52, %c0_53, %c0_54, %c0_55] : memref<1x4x16x16xf32, #tpu.memory_space<vmem>>, vector<1x4x16x16xf32>
    %99 = vector.shape_cast %98 : vector<1x4x16x16xf32> to vector<4x16x16xf32>
    %cst_56 = arith.constant dense<0.000000e+00> : vector<4x16x256xf32>
    %100 = tpu.matmul %99, %88, %cst_56 {dimension_numbers = #tpu.dot_dimension_numbers<[2], [1], [1], [2], [0, 0, 0, 1, 1, 2], [0], [0]>} : vector<4x16x16xf32>, vector<4x16x256xf32>, vector<4x16x256xf32> -> vector<4x16x256xf32>
    %101 = arith.mulf %97, %100 : vector<4x16x256xf32>
    %cst_57 = arith.constant dense<0.000000e+00> : vector<4x256xf32>
    %102 = vector.multi_reduction <add>, %101, %cst_57 [1] : vector<4x16x256xf32> to vector<4x256xf32>
    %c17_i32_58 = arith.constant 17 : i32
    %103 = tpu.dynamic_rotate %102 by %c17_i32_58 dim 1 : vector<4x256xf32>, i32 -> vector<4x256xf32>
    %c0_59 = arith.constant 0 : index
    %c0_60 = arith.constant 0 : index
    %c0_61 = arith.constant 0 : index
    %104 = vector.load %arg8[%c0_59, %c0_60, %c0_61] : memref<9x1x256xf32, #tpu.memory_space<vmem>>, vector<1x1x256xf32>
    %105 = vector.shape_cast %104 : vector<1x1x256xf32> to vector<1x256xf32>
    %106 = vector.broadcast %105 : vector<1x256xf32> to vector<4x256xf32>
    %107 = arith.mulf %103, %106 : vector<4x256xf32>
    %c0_62 = arith.constant 0 : index
    %c0_63 = arith.constant 0 : index
    %108 = vector.load %arg10[%c0_62, %c0_63] : memref<36x256xf32, #tpu.memory_space<vmem>>, vector<4x256xf32>
    tpu.vector_store %arg10[%c0_62, %c0_63], %107 {strides = array<i32>} : memref<36x256xf32, #tpu.memory_space<vmem>>, vector<4x256xf32>,
    %c16_i32_64 = arith.constant 16 : i32
    %109 = tpu.dynamic_rotate %102 by %c16_i32_64 dim 1 : vector<4x256xf32>, i32 -> vector<4x256xf32>
    %c1_65 = arith.constant 1 : index
    %c0_66 = arith.constant 0 : index
    %c0_67 = arith.constant 0 : index
    %110 = vector.load %arg8[%c1_65, %c0_66, %c0_67] : memref<9x1x256xf32, #tpu.memory_space<vmem>>, vector<1x1x256xf32>
    %111 = vector.shape_cast %110 : vector<1x1x256xf32> to vector<1x256xf32>
    %112 = vector.broadcast %111 : vector<1x256xf32> to vector<4x256xf32>
    %113 = arith.mulf %109, %112 : vector<4x256xf32>
    %c4_68 = arith.constant 4 : index
    %c0_69 = arith.constant 0 : index
    %114 = vector.load %arg10[%c4_68, %c0_69] : memref<36x256xf32, #tpu.memory_space<vmem>>, vector<4x256xf32>
    tpu.vector_store %arg10[%c4_68, %c0_69], %113 {strides = array<i32>} : memref<36x256xf32, #tpu.memory_space<vmem>>, vector<4x256xf32>,
    %c15_i32_70 = arith.constant 15 : i32
    %115 = tpu.dynamic_rotate %102 by %c15_i32_70 dim 1 : vector<4x256xf32>, i32 -> vector<4x256xf32>
    %c2_71 = arith.constant 2 : index
    %c0_72 = arith.constant 0 : index
    %c0_73 = arith.constant 0 : index
    %116 = vector.load %arg8[%c2_71, %c0_72, %c0_73] : memref<9x1x256xf32, #tpu.memory_space<vmem>>, vector<1x1x256xf32>
    %117 = vector.shape_cast %116 : vector<1x1x256xf32> to vector<1x256xf32>
    %118 = vector.broadcast %117 : vector<1x256xf32> to vector<4x256xf32>
    %119 = arith.mulf %115, %118 : vector<4x256xf32>
    %c8_74 = arith.constant 8 : index
    %c0_75 = arith.constant 0 : index
    %120 = vector.load %arg10[%c8_74, %c0_75] : memref<36x256xf32, #tpu.memory_space<vmem>>, vector<4x256xf32>
    tpu.vector_store %arg10[%c8_74, %c0_75], %119 {strides = array<i32>} : memref<36x256xf32, #tpu.memory_space<vmem>>, vector<4x256xf32>,
    %c1_i32_76 = arith.constant 1 : i32
    %121 = tpu.dynamic_rotate %102 by %c1_i32_76 dim 1 : vector<4x256xf32>, i32 -> vector<4x256xf32>
    %c3_77 = arith.constant 3 : index
    %c0_78 = arith.constant 0 : index
    %c0_79 = arith.constant 0 : index
    %122 = vector.load %arg8[%c3_77, %c0_78, %c0_79] : memref<9x1x256xf32, #tpu.memory_space<vmem>>, vector<1x1x256xf32>
    %123 = vector.shape_cast %122 : vector<1x1x256xf32> to vector<1x256xf32>
    %124 = vector.broadcast %123 : vector<1x256xf32> to vector<4x256xf32>
    %125 = arith.mulf %121, %124 : vector<4x256xf32>
    %c12_80 = arith.constant 12 : index
    %c0_81 = arith.constant 0 : index
    %126 = vector.load %arg10[%c12_80, %c0_81] : memref<36x256xf32, #tpu.memory_space<vmem>>, vector<4x256xf32>
    tpu.vector_store %arg10[%c12_80, %c0_81], %125 {strides = array<i32>} : memref<36x256xf32, #tpu.memory_space<vmem>>, vector<4x256xf32>,
    %c16_82 = arith.constant 16 : index
    %c0_83 = arith.constant 0 : index
    %127 = vector.load %arg10[%c16_82, %c0_83] : memref<36x256xf32, #tpu.memory_space<vmem>>, vector<4x256xf32>
    tpu.vector_store %arg10[%c16_82, %c0_83], %102 {strides = array<i32>} : memref<36x256xf32, #tpu.memory_space<vmem>>, vector<4x256xf32>,
    %c255_i32_84 = arith.constant 255 : i32
    %128 = tpu.dynamic_rotate %102 by %c255_i32_84 dim 1 : vector<4x256xf32>, i32 -> vector<4x256xf32>
    %c5_85 = arith.constant 5 : index
    %c0_86 = arith.constant 0 : index
    %c0_87 = arith.constant 0 : index
    %129 = vector.load %arg8[%c5_85, %c0_86, %c0_87] : memref<9x1x256xf32, #tpu.memory_space<vmem>>, vector<1x1x256xf32>
    %130 = vector.shape_cast %129 : vector<1x1x256xf32> to vector<1x256xf32>
    %131 = vector.broadcast %130 : vector<1x256xf32> to vector<4x256xf32>
    %132 = arith.mulf %128, %131 : vector<4x256xf32>
    %c20_88 = arith.constant 20 : index
    %c0_89 = arith.constant 0 : index
    %133 = vector.load %arg10[%c20_88, %c0_89] : memref<36x256xf32, #tpu.memory_space<vmem>>, vector<4x256xf32>
    tpu.vector_store %arg10[%c20_88, %c0_89], %132 {strides = array<i32>} : memref<36x256xf32, #tpu.memory_space<vmem>>, vector<4x256xf32>,
    %c241_i32_90 = arith.constant 241 : i32
    %134 = tpu.dynamic_rotate %102 by %c241_i32_90 dim 1 : vector<4x256xf32>, i32 -> vector<4x256xf32>
    %c6_91 = arith.constant 6 : index
    %c0_92 = arith.constant 0 : index
    %c0_93 = arith.constant 0 : index
    %135 = vector.load %arg8[%c6_91, %c0_92, %c0_93] : memref<9x1x256xf32, #tpu.memory_space<vmem>>, vector<1x1x256xf32>
    %136 = vector.shape_cast %135 : vector<1x1x256xf32> to vector<1x256xf32>
    %137 = vector.broadcast %136 : vector<1x256xf32> to vector<4x256xf32>
    %138 = arith.mulf %134, %137 : vector<4x256xf32>
    %c24_94 = arith.constant 24 : index
    %c0_95 = arith.constant 0 : index
    %139 = vector.load %arg10[%c24_94, %c0_95] : memref<36x256xf32, #tpu.memory_space<vmem>>, vector<4x256xf32>
    tpu.vector_store %arg10[%c24_94, %c0_95], %138 {strides = array<i32>} : memref<36x256xf32, #tpu.memory_space<vmem>>, vector<4x256xf32>,
    %c240_i32_96 = arith.constant 240 : i32
    %140 = tpu.dynamic_rotate %102 by %c240_i32_96 dim 1 : vector<4x256xf32>, i32 -> vector<4x256xf32>
    %c7_97 = arith.constant 7 : index
    %c0_98 = arith.constant 0 : index
    %c0_99 = arith.constant 0 : index
    %141 = vector.load %arg8[%c7_97, %c0_98, %c0_99] : memref<9x1x256xf32, #tpu.memory_space<vmem>>, vector<1x1x256xf32>
    %142 = vector.shape_cast %141 : vector<1x1x256xf32> to vector<1x256xf32>
    %143 = vector.broadcast %142 : vector<1x256xf32> to vector<4x256xf32>
    %144 = arith.mulf %140, %143 : vector<4x256xf32>
    %c28_100 = arith.constant 28 : index
    %c0_101 = arith.constant 0 : index
    %145 = vector.load %arg10[%c28_100, %c0_101] : memref<36x256xf32, #tpu.memory_space<vmem>>, vector<4x256xf32>
    tpu.vector_store %arg10[%c28_100, %c0_101], %144 {strides = array<i32>} : memref<36x256xf32, #tpu.memory_space<vmem>>, vector<4x256xf32>,
    %c239_i32_102 = arith.constant 239 : i32
    %146 = tpu.dynamic_rotate %102 by %c239_i32_102 dim 1 : vector<4x256xf32>, i32 -> vector<4x256xf32>
    %c8_103 = arith.constant 8 : index
    %c0_104 = arith.constant 0 : index
    %c0_105 = arith.constant 0 : index
    %147 = vector.load %arg8[%c8_103, %c0_104, %c0_105] : memref<9x1x256xf32, #tpu.memory_space<vmem>>, vector<1x1x256xf32>
    %148 = vector.shape_cast %147 : vector<1x1x256xf32> to vector<1x256xf32>
    %149 = vector.broadcast %148 : vector<1x256xf32> to vector<4x256xf32>
    %150 = arith.mulf %146, %149 : vector<4x256xf32>
    %c32_106 = arith.constant 32 : index
    %c0_107 = arith.constant 0 : index
    %151 = vector.load %arg10[%c32_106, %c0_107] : memref<36x256xf32, #tpu.memory_space<vmem>>, vector<4x256xf32>
    tpu.vector_store %arg10[%c32_106, %c0_107], %150 {strides = array<i32>} : memref<36x256xf32, #tpu.memory_space<vmem>>, vector<4x256xf32>,
    %c0_108 = arith.constant 0 : index
    %c0_109 = arith.constant 0 : index
    %152 = vector.load %arg10[%c0_108, %c0_109] : memref<36x256xf32, #tpu.memory_space<vmem>>, vector<36x256xf32>
    %cst_110 = arith.constant dense<0.000000e+00> : vector<8x256xf32>
    %153 = tpu.matmul %1, %152, %cst_110 {dimension_numbers = #tpu.dot_dimension_numbers<[1], [0], [0], [1], [0, 0, 1, 1], [], []>} : vector<8x36xf32>, vector<36x256xf32>, vector<8x256xf32> -> vector<8x256xf32>
    %154 = vector.broadcast %2 : vector<8x1xf32> to vector<8x256xf32>
    %155 = arith.addf %153, %154 : vector<8x256xf32>
    %c0_111 = arith.constant 0 : index
    %c0_112 = arith.constant 0 : index
    %c0_113 = arith.constant 0 : index
    %156 = vector.load %arg9[%c0_111, %c0_112, %c0_113] : memref<1x8x256xf32, #tpu.memory_space<vmem>>, vector<1x8x256xf32>
    %157 = vector.shape_cast %156 : vector<1x8x256xf32> to vector<8x256xf32>
    %158 = vector.shape_cast %155 : vector<8x256xf32> to vector<1x8x256xf32>
    tpu.vector_store %arg9[%c0_111, %c0_112, %c0_113], %158 {strides = array<i32>} : memref<1x8x256xf32, #tpu.memory_space<vmem>>, vector<1x8x256xf32>,
    return
  }
  func.func @transform_0(%arg0: i32) -> (i32, i32, i32, i32) {
    %c0_i32 = arith.constant 0 : i32
    %c0_i32_0 = arith.constant 0 : i32
    %c0_i32_1 = arith.constant 0 : i32
    %c0_i32_2 = arith.constant 0 : i32
    return %arg0, %c0_i32, %c0_i32_0, %c0_i32_1 : i32, i32, i32, i32
  }
  func.func @transform_1(%arg0: i32) -> (i32, i32, i32) {
    %c0_i32 = arith.constant 0 : i32
    %c0_i32_0 = arith.constant 0 : i32
    %c0_i32_1 = arith.constant 0 : i32
    return %arg0, %c0_i32, %c0_i32_0 : i32, i32, i32
  }
  func.func @transform_2(%arg0: i32) -> (i32, i32) {
    %c0_i32 = arith.constant 0 : i32
    %c0_i32_0 = arith.constant 0 : i32
    %c0_i32_1 = arith.constant 0 : i32
    return %c0_i32, %c0_i32_0 : i32, i32
  }
  func.func @transform_3(%arg0: i32) -> (i32, i32) {
    %c0_i32 = arith.constant 0 : i32
    %c0_i32_0 = arith.constant 0 : i32
    %c0_i32_1 = arith.constant 0 : i32
    return %c0_i32, %c0_i32_0 : i32, i32
  }
  func.func @transform_4(%arg0: i32) -> (i32, i32) {
    %c0_i32 = arith.constant 0 : i32
    %c0_i32_0 = arith.constant 0 : i32
    %c0_i32_1 = arith.constant 0 : i32
    return %c0_i32, %c0_i32_0 : i32, i32
  }
  func.func @transform_5(%arg0: i32) -> (i32, i32) {
    %c0_i32 = arith.constant 0 : i32
    %c0_i32_0 = arith.constant 0 : i32
    %c0_i32_1 = arith.constant 0 : i32
    return %c0_i32, %c0_i32_0 : i32, i32
  }
  func.func @transform_6(%arg0: i32) -> (i32, i32) {
    %c0_i32 = arith.constant 0 : i32
    %c0_i32_0 = arith.constant 0 : i32
    %c0_i32_1 = arith.constant 0 : i32
    return %c0_i32, %c0_i32_0 : i32, i32
  }
  func.func @transform_7(%arg0: i32) -> (i32, i32, i32) {
    %c0_i32 = arith.constant 0 : i32
    %c0_i32_0 = arith.constant 0 : i32
    %c0_i32_1 = arith.constant 0 : i32
    %c0_i32_2 = arith.constant 0 : i32
    return %c0_i32, %c0_i32_0, %c0_i32_1 : i32, i32, i32
  }
  func.func @transform_8(%arg0: i32) -> (i32, i32, i32) {
    %c0_i32 = arith.constant 0 : i32
    %c0_i32_0 = arith.constant 0 : i32
    %c0_i32_1 = arith.constant 0 : i32
    return %arg0, %c0_i32, %c0_i32_0 : i32, i32, i32
  }
}

</mosaic_0001>

<bundles_post_ra>
// kernel: conv2d_deformable_forward.1
= control target key start
LH: loop header
LB: loop body
LE: loop exit
PB: predicated region body
PF: predicated region fallthrough
CT: control target
= control target key end

     0   :  { %s1882_s27 = smov 0   ;;  %s2249_s0 = inlined_call_operand.vmem [shape: f32[2,4,16,16], index: 0, kind: input, shape index: {}]   ;;  %s2250_s1 = inlined_call_operand.vmem [shape: f32[2,4,256], index: 1, kind: input, shape index: {}]   ;;  %s2251_s2 = inlined_call_operand.vmem [shape: f32[8,36], index: 2, kind: input, shape index: {}]   ;;  %s2252_s3 = inlined_call_operand.vmem [shape: f32[8,36], index: 3, kind: input, shape index: {}]   ;;  %s2253_s4 = inlined_call_operand.vmem [shape: f32[8,1], index: 4, kind: input, shape index: {}]   ;;  %s2254_s5 = inlined_call_operand.vmem [shape: f32[1,256], index: 5, kind: input, shape index: {}]   ;;  %s2255_s6 = inlined_call_operand.vmem [shape: f32[1,256], index: 6, kind: input, shape index: {}]   ;;  %s2256_s7 = inlined_call_operand.vmem [shape: f32[9,1,256], index: 7, kind: input, shape index: {}]   ;;  %s2257_s8 = inlined_call_operand.vmem [shape: f32[2,8,256], index: 8, kind: output, shape index: {}]  }
   0x1 LB: > { %s1749_s28 = sadd.s32 4294967295, %s1824_s27   ;;  %p1753_p0 = scmp.ge.s32.totalorder %s1824_s27, 1  ;;  %s1824_s27 = sphi %s1882_s27, %s18_s27  }
   0x2   : > { %p272_p1 = scmp.lt.s32.totalorder %s1824_s27, 3 }
   0x4   : > { %p273_p2 = pnand %p1753_p0, %p272_p1 }
   0x5   : > { %p311_p3 = scmp.lt.s32.totalorder (!%p273_p2), %s1749_s28, 1  ;;  %s1826_s11 = smov (!%p273_p2), 111  }
   0x6   : > { %276 = sbr.rel (%p273_p2) target bundleno = 982 (0x3d6), region = 52  ;;  %s1827_s12 = smov (!%p273_p2), 112  }
   0x7   : > { %s1828_s13 = smov (!%p273_p2), 127   ;;  %s1829_s14 = smov (!%p273_p2), 113  }
   0x8   : > { %s1830_s15 = smov (!%p273_p2), 1   ;;  %s1831_s16 = smov (!%p273_p2), 16  }
   0x9   : > { %s1832_s17 = smov (!%p273_p2), 15   ;;  %s1834_s18 = smov (!%p273_p2), 17  }
   0xb   : > { %s2259_s28 = smov (!%p311_p3, %s1749_s28), 1  ;;  %v1833_v2 = vmov 0.0   ;;  %v331_v3 = vlaneseq  ;;  %v1766_v8 = vld [vmem:[%s2256_s7 + $0x10] sm:$0x3]  ;;  %v1763_v13 = vld [vmem:[%s2256_s7 + $0xa] sm:$0x3] }
   0xc   : > { %s1795_s29 = sshll.u32 %s2259_s28, 3  ;;  %644 = vmatprep.mubr.f32.mxu0 %v1833_v2  ;;  %1030 = vmatprep.mubr.f32.mxu1 %v1833_v2  ;;  %v1765_v14 = vld [vmem:[%s2256_s7 + $0xe] sm:$0x3]  ;;  %v1764_v21 = vld [vmem:[%s2256_s7 + $0xc] sm:$0x3]  ;;  %vm573_vm4 = vcmask 1043456  }
   0xd   : > { %s320_s10 = scalar_lea.vmem %s2250_s1, %s1795_s29  ;;  %v1914_v4 = vshrl.u32 %v331_v3, 7  ;;  %v1916_v5 = vand.u32 127, %v331_v3  ;;  %v1762_v38 = vld [vmem:[%s2256_s7 + $0x6] sm:$0x3]  ;;  %v1760_v53 = vld [vmem:[%s2256_s7 + $0x2] sm:$0x3] }
   0xe   : > { %v336_v0 = vld [vmem:[%s320_s10] sm:$0xff]  ;;  %vm569_vm9 = vcmask 293888   ;;  %vm959_vm10 = vcmask 130048   ;;  %s1794_s9 = sshll.u32 %s2259_s28, 6  ;;  %vm1372_vm11 = vcmask 1041409   ;;  %vm1374_vm12 = vcmask 1042434  }
   0xf   : > { %535 = vrot.lane.b32.xlu1 %v336_v0, %s1826_s11  ;;  %449 = vst [vmem:[#allocation2 + $0x48] sm:$0xf] %v336_v0  ;;  %505 = vrot.lane.b32.xlu0 %v336_v0, %s1827_s12  ;;  %v338_v1 = vcombine.high %v336_v0, %v336_v0  ;;  %v1919_v6 = vsub.s32 0, %v1914_v4  ;;  %v1922_v7 = vsub.s32 1, %v1914_v4  ;;  %vm539_vm0 = vcmp.lt.s32.totalorder %v1916_v5, 111  ;;  %s2057_s20 = scalar_lea.vmem %s2249_s0, %s1794_s9 }
  0x10   : > { %vm455_vm1 = vcmp.lt.s32.totalorder %v1916_v5, 127  ;;  %vm509_vm2 = vcmp.lt.s32.totalorder %v1916_v5, 112  ;;  %vm485_vm3 = vcmp.lt.s32.totalorder %v1916_v5, 113  ;;  %vm423_vm5 = vcmp.lt.s32.totalorder %v1916_v5, 1  ;;  %v1761_v62 = vld [vmem:[%s2256_s7 + $0x4] sm:$0x3] }
  0x11   : > { %450 = vst [vmem:[#allocation2 + $0x28] sm:$0xf] %v338_v1  ;;  %v548_v11 = vrot.slane %v1766_v8, %v1919_v6  ;;  %v552_v12 = vrot.slane %v1766_v8, %v1922_v7  ;;  %v464_v19 = vrot.slane %v1763_v13, %v1919_v6  ;;  %v468_v20 = vrot.slane %v1763_v13, %v1922_v7 }
  0x12   : > { %v518_v24 = vrot.slane %v1765_v14, %v1919_v6  ;;  %v522_v25 = vrot.slane %v1765_v14, %v1922_v7  ;;  %v494_v28 = vrot.slane %v1764_v21, %v1919_v6  ;;  %v498_v29 = vrot.slane %v1764_v21, %v1922_v7 }
  0x13   : > { %451 = vrot.lane.b32.xlu0 %v336_v0, %s1828_s13  ;;  %537 = vrot.lane.b32.xlu1 %v338_v1, %s1826_s11  ;;  %v432_v49 = vrot.slane %v1762_v38, %v1919_v6  ;;  %v436_v50 = vrot.slane %v1762_v38, %v1922_v7  ;;  %vm369_vm6 = vcmp.lt.s32.totalorder %v1916_v5, 16  ;;  %v378_v60 = vrot.slane %v1760_v53, %v1919_v6 }
  0x14   : > { %v382_v61 = vrot.slane %v1760_v53, %v1922_v7  ;;  %vm399_vm7 = vcmp.lt.s32.totalorder %v1916_v5, 15  ;;  %v412_v13 = vrot.slane %v1761_v62, %v1922_v7  ;;  %vm346_vm8 = vcmp.lt.s32.totalorder %v1916_v5, 17 }
  0x15   : > { %vm1376_vm13 = vcmask 1043459  }
  0x17   : > { %453 = vrot.lane.b32.xlu1 %v338_v1, %s1828_s13  ;;  %507 = vrot.lane.b32.xlu0 %v338_v1, %s1827_s12 }
  0x1b   : > { %483 = vrot.lane.b32.xlu1 %v338_v1, %s1829_s14  ;;  %481 = vrot.lane.b32.xlu0 %v336_v0, %s1829_s14 }
  0x1f   : > { %421 = vrot.lane.b32.xlu1 %v338_v1, %s1830_s15  ;;  %419 = vrot.lane.b32.xlu0 %v336_v0, %s1830_s15 }
  0x23   : > { %367 = vrot.lane.b32.xlu1 %v338_v1, %s1831_s16  ;;  %365 = vrot.lane.b32.xlu0 %v336_v0, %s1831_s16 }
  0x27   : > { %397 = vrot.lane.b32.xlu1 %v338_v1, %s1832_s17  ;;  %395 = vrot.lane.b32.xlu0 %v336_v0, %s1832_s17 }
  0x2b   : > { %342 = vrot.lane.b32.xlu1 %v338_v1, %s1834_s18  ;;  %340 = vrot.lane.b32.xlu0 %v336_v0, %s1834_s18 }
  0x81   : > { %v536_v9 = vpop.permute.xlu1 %535  ;;  %v506_v10 = vpop.permute.xlu0 %505 }
  0x85   : > { %v452_v15 = vpop.permute.xlu0 %451  ;;  %v538_v16 = vpop.permute.xlu1 %537 }
  0x86   : > { %v540_v17 = vsel %vm539_vm0, %v536_v9, %v538_v16  ;;  %v541_v18 = vsel %vm539_vm0, %v538_v16, %v536_v9  ;;  %v349_v16 = vld [vmem:[%s2256_s7] sm:$0x3] }
  0x87   : > { %v555_v22 = vmul.f32 %v548_v11, %v540_v17  ;;  %v556_v23 = vmul.f32 %v552_v12, %v541_v18  ;;  %v408_v12 = vrot.slane %v1761_v62, %v1919_v6 }
  0x89   : > { %557 = vst [vmem:[#allocation2 + $0x40] sm:$0xf] %v555_v22  ;;  %558 = vst [vmem:[#allocation2 + $0x38] sm:$0xf] %v556_v23  ;;  %v454_v26 = vpop.permute.xlu1 %453  ;;  %v508_v27 = vpop.permute.xlu0 %507 }
  0x8a   : > { %v456_v30 = vsel %vm455_vm1, %v452_v15, %v454_v26  ;;  %v457_v31 = vsel %vm455_vm1, %v454_v26, %v452_v15  ;;  %v510_v32 = vsel %vm509_vm2, %v506_v10, %v508_v27  ;;  %v511_v33 = vsel %vm509_vm2, %v508_v27, %v506_v10 }
  0x8b   : > { %v471_v34 = vmul.f32 %v464_v19, %v456_v30  ;;  %v472_v35 = vmul.f32 %v468_v20, %v457_v31  ;;  %v525_v36 = vmul.f32 %v518_v24, %v510_v32  ;;  %v526_v37 = vmul.f32 %v522_v25, %v511_v33 }
  0x8c   : > { %v354_v27 = vrot.slane %v349_v16, %v1919_v6 }
  0x8d   : > { %v475_v39 = vrot.slane %v471_v34, 4  ;;  %v476_v40 = vrot.slane %v472_v35, 4  ;;  %v529_v41 = vrot.slane %v525_v36, 4  ;;  %v530_v42 = vrot.slane %v526_v37, 4  ;;  %v484_v43 = vpop.permute.xlu1 %483  ;;  %v482_v44 = vpop.permute.xlu0 %481 }
  0x8e   : > { %v486_v45 = vsel %vm485_vm3, %v482_v44, %v484_v43  ;;  %v487_v46 = vsel %vm485_vm3, %v484_v43, %v482_v44 }
  0x8f   : > { %479 = vst [vmem:[#allocation2 + $0x48] sm:$0xf0] %v475_v39  ;;  %480 = vst [vmem:[#allocation2 + $0x28] sm:$0xf0] %v476_v40  ;;  %v501_v47 = vmul.f32 %v494_v28, %v486_v45  ;;  %v502_v48 = vmul.f32 %v498_v29, %v487_v46  ;;  %v358_v28 = vrot.slane %v349_v16, %v1922_v7  ;;  %v326_v39 = vld [vmem:[%s2251_s2] sm:$0xff] }
  0x90   : > { %533 = vst [vmem:[#allocation2 + $0x8] sm:$0xf0] %v529_v41  ;;  %534 = vst [vmem:[#allocation2 + $0x20] sm:$0xf0] %v530_v42  ;;  %v568_v51 = vld [vmem:[#allocation2 + $0x38] sm:$0xf] }
  0x91   : > { %v567_v52 = vld [vmem:[#allocation2 + $0x40] sm:$0xf]  ;;  %503 = vst [vmem:[#allocation2 + $0x8] sm:$0xf] %v501_v47  ;;  %504 = vst [vmem:[#allocation2 + $0x20] sm:$0xf] %v502_v48  ;;  %1767 = vmatprep.subr.msk.mxu0 %vm573_vm4, %v568_v51  ;;  %v422_v54 = vpop.permute.xlu1 %421  ;;  %v420_v55 = vpop.permute.xlu0 %419 }
  0x92   : > { %v424_v56 = vsel %vm423_vm5, %v420_v55, %v422_v54  ;;  %v425_v57 = vsel %vm423_vm5, %v422_v54, %v420_v55  ;;  %1768 = vmatpush1.msk.msra.mxu0 %vm573_vm4, %v567_v52  ;;  %v329_v40 = vld [vmem:[%s2254_s5] sm:$0x3]  ;;  %v1835_v47 = vmov 1966171168  }
  0x93   : > { %v439_v58 = vmul.f32 %v432_v49, %v425_v57  ;;  %v440_v59 = vmul.f32 %v436_v50, %v424_v56  ;;  %v330_v41 = vld [vmem:[%s2255_s6] sm:$0x3]  ;;  %v655_v42 = vrot.slane %v329_v40, %v1919_v6  ;;  %v659_v44 = vrot.slane %v329_v40, %v1922_v7 }
  0x94   : > { %v668_v43 = vrot.slane %v330_v41, %v1919_v6  ;;  %v672_v45 = vrot.slane %v330_v41, %v1922_v7  ;;  %v693_v48 = vunpack.c.l.s4 %v1835_v47 }
  0x95   : > { %v443_v63 = vrot.slane %v439_v58, 4  ;;  %v444_v0 = vrot.slane %v440_v59, 4  ;;  %v368_v1 = vpop.permute.xlu1 %367  ;;  %v366_v3 = vpop.permute.xlu0 %365 }
  0x96   : > { %v370_v8 = vsel %vm369_vm6, %v366_v3, %v368_v1  ;;  %v371_v9 = vsel %vm369_vm6, %v368_v1, %v366_v3  ;;  %v564_v23 = vld [vmem:[#allocation2 + $0x28] sm:$0xff]  ;;  %v694_v56 = vunpack.c.0.s8 %v693_v48 }
  0x97   : > { %447 = vst [vmem:[#allocation2 + $0x18] sm:$0xf0] %v443_v63  ;;  %448 = vst [vmem:[#allocation2 + $0x10] sm:$0xf0] %v444_v0  ;;  %v385_v10 = vmul.f32 %v378_v60, %v371_v9  ;;  %v386_v11 = vmul.f32 %v382_v61, %v370_v8  ;;  %v563_v26 = vld [vmem:[#allocation2 + $0x48] sm:$0xff]  ;;  %v333_v9 = vadd.s32 8, %v1914_v4 }
  0x98   : > { %v566_v14 = vld [vmem:[#allocation2 + $0x20] sm:$0xff]  ;;  %v565_v15 = vld [vmem:[#allocation2 + $0x8] sm:$0xff]  ;;  %v697_v63 = vsub.s32 %v694_v56, %v1914_v4 }
  0x99   : > { %v389_v17 = vrot.slane %v385_v10, 4  ;;  %v390_v18 = vrot.slane %v386_v11, 4  ;;  %v398_v19 = vpop.permute.xlu1 %397  ;;  %604 = vmatprep.subr.mxu0 %v566_v14  ;;  %v396_v20 = vpop.permute.xlu0 %395  ;;  %v2024_v14 = vcvt.s32.f32 %v1914_v4 }
  0x9a   : > { %v400_v21 = vsel %vm399_vm7, %v396_v20, %v398_v19  ;;  %v401_v22 = vsel %vm399_vm7, %v398_v19, %v396_v20  ;;  %605 = vmatpush1.msra.mxu0 %v565_v15  ;;  %v2026_v15 = vcvt.s32.f32 %v333_v9 }
  0x9b   : > { %393 = vst [vmem:[#allocation2 + $0x30] sm:$0xf0] %v389_v17  ;;  %394 = vst [vmem:[#allocation2] sm:$0xf0] %v390_v18  ;;  %v415_v24 = vmul.f32 %v408_v12, %v401_v22  ;;  %v416_v25 = vmul.f32 %v412_v13, %v400_v21  ;;  %606 = vmatprep.subr.mxu0 %v564_v23 }
  0x9c   : > { %607 = vmatpush1.msra.mxu0 %v563_v26 }
  0x9d   : > { %417 = vst [vmem:[#allocation2 + $0x18] sm:$0xf] %v415_v24  ;;  %418 = vst [vmem:[#allocation2 + $0x10] sm:$0xf] %v416_v25  ;;  %v343_v29 = vpop.permute.xlu1 %342  ;;  %v341_v30 = vpop.permute.xlu0 %340 }
  0x9e   : > { %v347_v31 = vsel %vm346_vm8, %v341_v30, %v343_v29  ;;  %v348_v32 = vsel %vm346_vm8, %v343_v29, %v341_v30 }
  0x9f   : > { %v361_v33 = vmul.f32 %v354_v27, %v348_v32  ;;  %v362_v34 = vmul.f32 %v358_v28, %v347_v31 }
  0xa1   : > { %363 = vst [vmem:[#allocation2 + $0x30] sm:$0xf] %v361_v33  ;;  %364 = vst [vmem:[#allocation2] sm:$0xf] %v362_v34 }
  0xa4   : > { %v562_v35 = vld [vmem:[#allocation2 + $0x10] sm:$0xff]  ;;  %v561_v36 = vld [vmem:[#allocation2 + $0x18] sm:$0xff] }
  0xa5   : > { %608 = vmatprep.subr.mxu0 %v562_v35 }
  0xa6   : > { %609 = vmatpush1.msra.mxu0 %v561_v36 }
  0xa8   : > { %v560_v37 = vld [vmem:[#allocation2] sm:$0xff]  ;;  %v559_v38 = vld [vmem:[#allocation2 + $0x30] sm:$0xff] }
  0xa9   : > { %610 = vmatprep.subr.mxu0 %v560_v37 }
  0xaa   : > { %611 = vmatpush1.msra.mxu0 %v559_v38 }
  0xab   : > { %1769 = vmatmul.mubr.msk.f32.vlgmr.msra.gmra.mxu0 %vm569_vm9, %v326_v39 }
  0xac   : > { %1196 = vmatprep.mubr.f32.mxu0 %v1833_v2 }
 0x16b   : > { %v646_v46 = vpop.f32.mrf.mxu0 }
 0x16c   : > { %v662_v49 = vadd.f32 %v655_v42, %v646_v46  ;;  %v675_v50 = vadd.f32 %v668_v43, %v646_v46 }
 0x16d   : > { %v648_v51 = vpop.f32.mrf.mxu0 }
 0x16e   : > { %v677_v52 = vadd.f32 1.0, %v662_v49  ;;  %v683_v53 = vadd.f32 1.0, %v675_v50  ;;  %v663_v54 = vadd.f32 %v659_v44, %v648_v51  ;;  %v676_v55 = vadd.f32 %v672_v45, %v648_v51 }
 0x170   : > { %v679_v57 = vmul.f32 8.0, %v677_v52  ;;  %v685_v58 = vmul.f32 8.0, %v683_v53  ;;  %v678_v59 = vadd.f32 1.0, %v663_v54  ;;  %v684_v60 = vadd.f32 1.0, %v676_v55 }
 0x172   : > { %v680_v61 = vmul.f32 8.0, %v678_v59  ;;  %v686_v62 = vmul.f32 8.0, %v684_v60  ;;  %v1770_v0 = vadd.f32 -0.5, %v679_v57  ;;  %v1772_v1 = vadd.f32 -0.5, %v685_v58 }
 0x174   : > { %v1771_v3 = vadd.f32 -0.5, %v680_v61  ;;  %v1773_v8 = vadd.f32 -0.5, %v686_v62 }
 0x176   : > { %v691_v10 = vcombine.low %v1772_v1, %v1773_v8  ;;  %v822_v11 = vcombine.high %v1770_v0, %v1771_v3  ;;  %v951_v0 = vld [vmem:[%s2057_s20] sm:$0xff] }
 0x178   : > { %v698_v12 = vrot.slane %v691_v10, %v697_v63  ;;  %v829_v13 = vrot.slane %v822_v11, %v697_v63 }
 0x17a   : > { %v699_v16 = vcombine.high %v698_v12, %v698_v12  ;;  %v830_v17 = vcombine.high %v829_v13, %v829_v13  ;;  %v837_v18 = vrot.slane %v829_v13, %v697_v63  ;;  %v706_v19 = vrot.slane %v698_v12, %v697_v63 }
 0x17c   : > { %v713_v20 = vrot.slane %v699_v16, %v697_v63  ;;  %v723_v21 = vrot.slane %v706_v19, %v1922_v7  ;;  %v719_v22 = vrot.slane %v706_v19, %v1919_v6  ;;  %v714_v23 = vcombine.high %v706_v19, %v706_v19 }
 0x17d   : > { %v2031_v24 = vrot.slane %v837_v18, %v1919_v6  ;;  %v2034_v25 = vrot.slane %v837_v18, %v1922_v7  ;;  %v2036_v4 = vcombine.high %v837_v18, %v837_v18  ;;  %v2038_v26 = vrot.slane %v830_v17, %v697_v63 }
 0x17e   : > { %v759_v27 = vsub.f32 %v2026_v15, %v723_v21  ;;  %v758_v28 = vsub.f32 %v2026_v15, %v719_v22  ;;  %v757_v29 = vsub.f32 %v2024_v14, %v723_v21  ;;  %v739_v30 = vrot.slane %v714_v23, %v1922_v7 }
 0x17f   : > { %v756_v31 = vsub.f32 %v2024_v14, %v719_v22  ;;  %v735_v32 = vrot.slane %v714_v23, %v1919_v6  ;;  %v731_v33 = vrot.slane %v713_v20, %v1922_v7  ;;  %v727_v34 = vrot.slane %v713_v20, %v1919_v6 }
 0x180   : > { %v775_v35 = vand.u32 2147483647, %v759_v27  ;;  %v774_v36 = vand.u32 2147483647, %v758_v28  ;;  %v773_v37 = vand.u32 2147483647, %v757_v29  ;;  %v767_v38 = vsub.f32 %v2026_v15, %v739_v30 }
 0x181   : > { %v772_v39 = vand.u32 2147483647, %v756_v31  ;;  %v766_v40 = vsub.f32 %v2026_v15, %v735_v32  ;;  %v763_v41 = vsub.f32 %v2026_v15, %v731_v33  ;;  %v765_v42 = vsub.f32 %v2024_v14, %v739_v30  ;;  %v955_v30 = vld [vmem:[%s2057_s20 + $0x20] sm:$0xff] }
 0x182   : > { %v791_v43 = vsub.f32 1.0, %v775_v35  ;;  %v790_v44 = vsub.f32 1.0, %v774_v36  ;;  %v789_v45 = vsub.f32 1.0, %v773_v37  ;;  %v783_v46 = vand.u32 2147483647, %v767_v38 }
 0x183   : > { %v788_v47 = vsub.f32 1.0, %v772_v39  ;;  %v782_v48 = vand.u32 2147483647, %v766_v40  ;;  %v779_v49 = vand.u32 2147483647, %v763_v41  ;;  %v762_v50 = vsub.f32 %v2026_v15, %v727_v34 }
 0x184   : > { %v807_v51 = vmax.f32 %v791_v43, 0.0  ;;  %v806_v52 = vmax.f32 %v790_v44, 0.0  ;;  %v805_v53 = vmax.f32 %v789_v45, 0.0  ;;  %v799_v54 = vsub.f32 1.0, %v783_v46  ;;  %v956_v44 = vld [vmem:[%s2057_s20 + $0x28] sm:$0xff] }
 0x185   : > { %v804_v55 = vmax.f32 %v788_v47, 0.0  ;;  %v798_v56 = vsub.f32 1.0, %v782_v48  ;;  %v795_v57 = vsub.f32 1.0, %v779_v49  ;;  %v781_v58 = vand.u32 2147483647, %v765_v42  ;;  %v953_v47 = vld [vmem:[%s2057_s20 + $0x10] sm:$0xff] }
 0x186   : > { %994 = vmatprep.subr.mxu1 %v807_v51  ;;  %v815_v59 = vmax.f32 %v799_v54, 0.0  ;;  %v778_v60 = vand.u32 2147483647, %v762_v50  ;;  %v764_v61 = vsub.f32 %v2024_v14, %v735_v32  ;;  %v761_v62 = vsub.f32 %v2024_v14, %v731_v33 }
 0x187   : > { %995 = vmatpush1.msra.mxu1 %v806_v52  ;;  %v814_v63 = vmax.f32 %v798_v56, 0.0  ;;  %v811_v1 = vmax.f32 %v795_v57, 0.0  ;;  %v797_v3 = vsub.f32 1.0, %v781_v58  ;;  %v760_v8 = vsub.f32 %v2024_v14, %v727_v34  ;;  %v952_v34 = vld [vmem:[%s2057_s20 + $0x8] sm:$0xff]  ;;  %v954_v58 = vld [vmem:[%s2057_s20 + $0x18] sm:$0xff] }
 0x188   : > { %996 = vmatprep.subr.mxu1 %v805_v53  ;;  %1160 = vmatprep.subr.mxu0 %v815_v59  ;;  %v794_v9 = vsub.f32 1.0, %v778_v60  ;;  %v780_v10 = vand.u32 2147483647, %v764_v61  ;;  %v777_v11 = vand.u32 2147483647, %v761_v62  ;;  %v715_v12 = vcombine.high %v713_v20, %v713_v20 }
 0x189   : > { %997 = vmatpush1.msra.mxu1 %v804_v55  ;;  %1161 = vmatpush1.msra.mxu0 %v814_v63  ;;  %v813_v13 = vmax.f32 %v797_v3, 0.0  ;;  %v776_v16 = vand.u32 2147483647, %v760_v8  ;;  %v887_v17 = vsub.f32 %v2024_v14, %v2031_v24  ;;  %v888_v18 = vsub.f32 %v2024_v14, %v2034_v25 }
 0x18a   : > { %1774 = vmatmul.mubr.msk.f32.vlgmr.msra.gmra.mxu1 %vm959_vm10, %v951_v0  ;;  %1077 = vmatprep.subr.mxu1 %v811_v1  ;;  %v810_v19 = vmax.f32 %v794_v9, 0.0  ;;  %v796_v21 = vsub.f32 1.0, %v780_v10  ;;  %v793_v22 = vsub.f32 1.0, %v777_v11  ;;  %v747_v20 = vrot.slane %v715_v12, %v1922_v7  ;;  %v957_v1 = vld [vmem:[%s2057_s20 + $0x30] sm:$0xff]  ;;  %v958_v10 = vld [vmem:[%s2057_s20 + $0x38] sm:$0xff] }
 0x18b   : > { %1162 = vmatprep.subr.mxu0 %v813_v13  ;;  %1036 = vmatprep.mubr.f32.mxu1 %v1833_v2  ;;  %v792_v23 = vsub.f32 1.0, %v776_v16  ;;  %v743_v27 = vrot.slane %v715_v12, %v1919_v6  ;;  %v866_v39 = vrot.slane %v2036_v4, %v1919_v6  ;;  %v889_v42 = vsub.f32 %v2026_v15, %v2031_v24 }
 0x18c   : > { %1078 = vmatpush1.msra.mxu1 %v810_v19  ;;  %v812_v28 = vmax.f32 %v796_v21, 0.0  ;;  %v809_v29 = vmax.f32 %v793_v22, 0.0  ;;  %v771_v31 = vsub.f32 %v2026_v15, %v747_v20  ;;  %v769_v32 = vsub.f32 %v2024_v14, %v747_v20 }
 0x18d   : > { %v808_v33 = vmax.f32 %v792_v23, 0.0  ;;  %v770_v35 = vsub.f32 %v2026_v15, %v743_v27  ;;  %v768_v36 = vsub.f32 %v2024_v14, %v743_v27  ;;  %v895_v46 = vsub.f32 %v2024_v14, %v866_v39 }
 0x18e   : > { %1163 = vmatpush1.msra.mxu0 %v812_v28  ;;  %1079 = vmatprep.subr.mxu1 %v809_v29  ;;  %v787_v37 = vand.u32 2147483647, %v771_v31  ;;  %v785_v38 = vand.u32 2147483647, %v769_v32  ;;  %v870_v50 = vrot.slane %v2036_v4, %v1922_v7  ;;  %v890_v52 = vsub.f32 %v2026_v15, %v2034_v25 }
 0x18f   : > { %1778 = vmatmul.mubr.msk.f32.vlgmr.msra.gmra.mxu0 %vm959_vm10, %v955_v30  ;;  %1080 = vmatpush1.msra.mxu1 %v808_v33  ;;  %v786_v40 = vand.u32 2147483647, %v770_v35  ;;  %v784_v41 = vand.u32 2147483647, %v768_v36  ;;  %v897_v56 = vsub.f32 %v2026_v15, %v866_v39  ;;  %v858_v57 = vrot.slane %v2038_v26, %v1919_v6 }
 0x190   : > { %1775 = vmatmul.mubr.msk.f32.gmra.mxu1 %vm959_vm10, %v952_v34  ;;  %v803_v43 = vsub.f32 1.0, %v787_v37  ;;  %1202 = vmatprep.mubr.f32.mxu0 %v1833_v2  ;;  %v801_v45 = vsub.f32 1.0, %v785_v38  ;;  %v896_v54 = vsub.f32 %v2024_v14, %v870_v50  ;;  %v898_v59 = vsub.f32 %v2026_v15, %v870_v50 }
 0x191   : > { %1113 = vmatprep.mubr.f32.mxu1 %v1833_v2  ;;  %v802_v48 = vsub.f32 1.0, %v786_v40  ;;  %v800_v49 = vsub.f32 1.0, %v784_v41  ;;  %v862_v60 = vrot.slane %v2038_v26, %v1922_v7  ;;  %v891_v61 = vsub.f32 %v2024_v14, %v858_v57 }
 0x192   : > { %v819_v51 = vmax.f32 %v803_v43, 0.0  ;;  %v817_v55 = vmax.f32 %v801_v45, 0.0  ;;  %v893_v63 = vsub.f32 %v2026_v15, %v858_v57  ;;  %v846_v3 = vcombine.high %v2038_v26, %v2038_v26 }
 0x193   : > { %1779 = vmatmul.mubr.msk.f32.gmra.mxu0 %vm959_vm10, %v956_v44  ;;  %v818_v53 = vmax.f32 %v802_v48, 0.0  ;;  %v816_v4 = vmax.f32 %v800_v49, 0.0  ;;  %v892_v62 = vsub.f32 %v2024_v14, %v862_v60  ;;  %v894_v0 = vsub.f32 %v2026_v15, %v862_v60 }
 0x194   : > { %1243 = vmatprep.subr.mxu1 %v819_v51  ;;  %1776 = vmatmul.mubr.msk.f32.vlgmr.msra.gmra.mxu1 %vm959_vm10, %v953_v47  ;;  %v2115_v8 = vrot.slane %v846_v3, %v1919_v6  ;;  %v2118_v9 = vrot.slane %v846_v3, %v1922_v7  ;;  %v903_v16 = vand.u32 2147483647, %v887_v17  ;;  %v904_v19 = vand.u32 2147483647, %v888_v18 }
 0x195   : > { %1244 = vmatpush1.msra.mxu1 %v818_v53  ;;  %1119 = vmatprep.mubr.f32.mxu1 %v1833_v2  ;;  %v911_v21 = vand.u32 2147483647, %v895_v46  ;;  %v906_v22 = vand.u32 2147483647, %v890_v52  ;;  %v912_v23 = vand.u32 2147483647, %v896_v54 }
 0x196   : > { %1245 = vmatprep.subr.mxu1 %v817_v55  ;;  %1673 = vmatprep.mubr.f32.mxu0 %v1833_v2  ;;  %v899_v11 = vsub.f32 %v2024_v14, %v2115_v8  ;;  %v900_v12 = vsub.f32 %v2024_v14, %v2118_v9  ;;  %v901_v26 = vsub.f32 %v2026_v15, %v2115_v8  ;;  %v913_v27 = vand.u32 2147483647, %v897_v56 }
 0x197   : > { %1246 = vmatpush1.msra.mxu1 %v816_v4  ;;  %v902_v13 = vsub.f32 %v2026_v15, %v2118_v9  ;;  %v914_v28 = vand.u32 2147483647, %v898_v59  ;;  %v919_v29 = vsub.f32 1.0, %v903_v16  ;;  %v920_v31 = vsub.f32 1.0, %v904_v19 }
 0x198   : > { %1777 = vmatmul.mubr.msk.f32.gmra.mxu1 %vm959_vm10, %v954_v58  ;;  %v907_v33 = vand.u32 2147483647, %v891_v61  ;;  %v922_v34 = vsub.f32 1.0, %v906_v22  ;;  %v908_v35 = vand.u32 2147483647, %v892_v62  ;;  %v927_v24 = vsub.f32 1.0, %v911_v21 }
 0x199   : > { %1279 = vmatprep.mubr.f32.mxu1 %v1833_v2  ;;  %v928_v17 = vsub.f32 1.0, %v912_v23  ;;  %v929_v36 = vsub.f32 1.0, %v913_v27  ;;  %v930_v37 = vsub.f32 1.0, %v914_v28  ;;  %v935_v38 = vmax.f32 %v919_v29, 0.0 }
 0x19a   : > { %v909_v18 = vand.u32 2147483647, %v893_v63  ;;  %v936_v39 = vmax.f32 %v920_v31, 0.0  ;;  %v923_v41 = vsub.f32 1.0, %v907_v33  ;;  %v938_v46 = vmax.f32 %v922_v34, 0.0 }
 0x19b   : > { %v924_v47 = vsub.f32 1.0, %v908_v35  ;;  %v943_v48 = vmax.f32 %v927_v24, 0.0  ;;  %v944_v49 = vmax.f32 %v928_v17, 0.0  ;;  %v945_v51 = vmax.f32 %v929_v36, 0.0 }
 0x19c   : > { %1780 = vmatmul.mubr.msk.f32.vlgmr.msra.gmra.mxu1 %vm959_vm10, %v957_v1  ;;  %v946_v52 = vmax.f32 %v930_v37, 0.0  ;;  %v925_v57 = vsub.f32 1.0, %v909_v18  ;;  %v939_v59 = vmax.f32 %v923_v41, 0.0  ;;  %v915_v3 = vand.u32 2147483647, %v899_v11 }
 0x19d   : > { %1285 = vmatprep.mubr.f32.mxu1 %v1833_v2  ;;  %v905_v2 = vand.u32 2147483647, %v889_v42  ;;  %v910_v42 = vand.u32 2147483647, %v894_v0  ;;  %v940_v1 = vmax.f32 %v924_v47, 0.0 }
 0x19e   : > { %v916_v21 = vand.u32 2147483647, %v900_v12  ;;  %v941_v23 = vmax.f32 %v925_v57, 0.0  ;;  %v917_v27 = vand.u32 2147483647, %v901_v26  ;;  %v931_v35 = vsub.f32 1.0, %v915_v3 }
 0x19f   : > { %v921_v30 = vsub.f32 1.0, %v905_v2  ;;  %v926_v61 = vsub.f32 1.0, %v910_v42  ;;  %v918_v11 = vand.u32 2147483647, %v902_v13 }
 0x1a0   : > { %1781 = vmatmul.mubr.msk.f32.gmra.mxu1 %vm959_vm10, %v958_v10  ;;  %v932_v37 = vsub.f32 1.0, %v916_v21 }
 0x1a1   : > { %v937_v25 = vmax.f32 %v921_v30, 0.0  ;;  %v942_v31 = vmax.f32 %v926_v61, 0.0  ;;  %v934_v41 = vsub.f32 1.0, %v918_v11 }
 0x24a   : > { %v1032_v20 = vpop.f32.mrf.mxu1 }
 0x24b   : > { %v1292_v43 = vmul.f32 %v1032_v20, %v935_v38 }
 0x24c   : > { %v1034_v32 = vpop.f32.mrf.mxu1 }
 0x24d   : > { %v1293_v53 = vmul.f32 %v1034_v32, %v936_v39 }
 0x24f   : > { %v1198_v14 = vpop.f32.mrf.mxu0 }
 0x250   : > { %v1038_v40 = vpop.f32.mrf.mxu1  ;;  %v1300_v4 = vmul.f32 %v1198_v14, %v943_v48  ;;  %v933_v14 = vsub.f32 1.0, %v917_v27 }
 0x251   : > { %v1294_v44 = vmul.f32 %v1038_v40, %v937_v25  ;;  %v1200_v45 = vpop.f32.mrf.mxu0 }
 0x252   : > { %v1040_v50 = vpop.f32.mrf.mxu1  ;;  %v1301_v10 = vmul.f32 %v1200_v45, %v944_v49  ;;  %v949_v47 = vmax.f32 %v933_v14, 0.0 }
 0x253   : > { %v1308_v54 = vadd.f32 %v1294_v44, %v1292_v43  ;;  %v1295_v55 = vmul.f32 %v1040_v50, %v938_v46  ;;  %v1204_v56 = vpop.f32.mrf.mxu0  ;;  %v947_v46 = vmax.f32 %v931_v35, 0.0  ;;  %v948_v50 = vmax.f32 %v932_v37, 0.0 }
 0x254   : > { %v1302_v58 = vmul.f32 %v1204_v56, %v945_v51  ;;  %v1115_v60 = vpop.f32.mrf.mxu1 }
 0x255   : > { %v1309_v62 = vrot.slane %v1308_v54, 4  ;;  %v1315_v63 = vadd.f32 %v1295_v55, %v1293_v53  ;;  %v1206_v0 = vpop.f32.mrf.mxu0  ;;  %v1296_v33 = vmul.f32 %v1115_v60, %v939_v59 }
 0x256   : > { %v1336_v16 = vadd.f32 %v1302_v58, %v1300_v4  ;;  %v1303_v2 = vmul.f32 %v1206_v0, %v946_v52  ;;  %v1117_v19 = vpop.f32.mrf.mxu1  ;;  %v950_v52 = vmax.f32 %v934_v41, 0.0 }
 0x257   : > { %v1310_v22 = vadd.f32 %v1309_v62, %v1308_v54  ;;  %v1316_v20 = vrot.slane %v1315_v63, 4  ;;  %v1297_v38 = vmul.f32 %v1117_v19, %v940_v1 }
 0x258   : > { %v1337_v28 = vrot.slane %v1336_v16, 4  ;;  %v1343_v29 = vadd.f32 %v1303_v2, %v1301_v10  ;;  %v1121_v30 = vpop.f32.mrf.mxu1 }
 0x259   : > { %v1317_v32 = vadd.f32 %v1316_v20, %v1315_v63  ;;  %v1298_v34 = vmul.f32 %v1121_v30, %v941_v23  ;;  %v1311_v12 = vrot.slane %v1310_v22, 2 }
 0x25a   : > { %v1338_v24 = vadd.f32 %v1337_v28, %v1336_v16  ;;  %v1344_v17 = vrot.slane %v1343_v29, 4  ;;  %v1123_v36 = vpop.f32.mrf.mxu1 }
 0x25b   : > { %v1322_v8 = vadd.f32 %v1298_v34, %v1296_v33  ;;  %v1299_v26 = vmul.f32 %v1123_v36, %v942_v31  ;;  %v1318_v25 = vrot.slane %v1317_v32, 2  ;;  %v1312_v13 = vadd.f32 %v1311_v12, %v1310_v22 }
 0x25c   : > { %v1339_v18 = vrot.slane %v1338_v24, 2  ;;  %v1345_v39 = vadd.f32 %v1344_v17, %v1343_v29  ;;  %v1281_v40 = vpop.f32.mrf.mxu1 }
 0x25d   : > { %v1323_v15 = vrot.slane %v1322_v8, 4  ;;  %v1329_v9 = vadd.f32 %v1299_v26, %v1297_v38  ;;  %v1319_v48 = vadd.f32 %v1318_v25, %v1317_v32  ;;  %v1304_v55 = vmul.f32 %v1281_v40, %v947_v46  ;;  %v1787_v40 = vld [vmem:[%s2256_s7 + $0xe] sm:$0x3] }
 0x25e   : > { %v1346_v42 = vrot.slane %v1345_v39, 2  ;;  %v1283_v43 = vpop.f32.mrf.mxu1  ;;  %v1340_v49 = vadd.f32 %v1339_v18, %v1338_v24  ;;  %v1313_v57 = vrot.slane %v1312_v13, 1  ;;  %v328_v18 = vld [vmem:[%s2253_s4] sm:$0xff] }
 0x25f   : > { %v1324_v44 = vadd.f32 %v1323_v15, %v1322_v8  ;;  %v1330_v45 = vrot.slane %v1329_v9, 4  ;;  %v1305_v58 = vmul.f32 %v1283_v43, %v948_v50  ;;  %v1320_v0 = vrot.slane %v1319_v48, 1  ;;  %v1785_v50 = vld [vmem:[%s2256_s7 + $0xa] sm:$0x3] }
 0x260   : > { %v1287_v51 = vpop.f32.mrf.mxu1  ;;  %v1347_v4 = vadd.f32 %v1346_v42, %v1345_v39  ;;  %v1341_v1 = vrot.slane %v1340_v49, 1  ;;  %v1314_v19 = vadd.f32 %v1313_v57, %v1312_v13  ;;  %v1836_v39 = vmov 0   ;;  %v1788_v13 = vld [vmem:[%s2256_s7 + $0x10] sm:$0x3] }
 0x261   : > { %v1325_v53 = vrot.slane %v1324_v44, 2  ;;  %v1331_v54 = vadd.f32 %v1330_v45, %v1329_v9  ;;  %v1306_v56 = vmul.f32 %v1287_v51, %v949_v47  ;;  %v1321_v28 = vadd.f32 %v1320_v0, %v1319_v48  ;;  %1816 = vset.pattern.permute.xlu0 %v1836_v39 }
 0x262   : > { %v1289_v59 = vpop.f32.mrf.mxu1  ;;  %v1348_v21 = vrot.slane %v1347_v4, 1  ;;  %v1342_v29 = vadd.f32 %v1341_v1, %v1340_v49  ;;  %v1546_v15 = vrot.slane %v1787_v40, %v1919_v6  ;;  %v1550_v9 = vrot.slane %v1787_v40, %v1922_v7 }
 0x263   : > { %v1326_v60 = vadd.f32 %v1325_v53, %v1324_v44  ;;  %v1332_v61 = vrot.slane %v1331_v54, 2  ;;  %v1350_v62 = vadd.f32 %v1306_v56, %v1304_v55  ;;  %v1307_v63 = vmul.f32 %v1289_v59, %v950_v52 }
 0x264   : > { %v1349_v33 = vadd.f32 %v1348_v21, %v1347_v4  ;;  %v1574_v48 = vrot.slane %v1788_v13, %v1919_v6  ;;  %v1578_v49 = vrot.slane %v1788_v13, %v1922_v7  ;;  %v1500_v59 = vrot.slane %v1785_v50, %v1922_v7 }
 0x265   : > { %v1327_v3 = vrot.slane %v1326_v60, 1  ;;  %v1333_v10 = vadd.f32 %v1332_v61, %v1331_v54  ;;  %v1351_v16 = vrot.slane %v1350_v62, 4  ;;  %v1357_v2 = vadd.f32 %v1307_v63, %v1305_v58 }
 0x266   : > { %v1496_v58 = vrot.slane %v1785_v50, %v1919_v6 }
 0x267   : > { %v1328_v22 = vadd.f32 %v1327_v3, %v1326_v60  ;;  %v1334_v20 = vrot.slane %v1333_v10, 1  ;;  %v1352_v23 = vadd.f32 %v1351_v16, %v1350_v62  ;;  %v1358_v27 = vrot.slane %v1357_v2, 4  ;;  %v1786_v60 = vld [vmem:[%s2256_s7 + $0xc] sm:$0x3] }
 0x268   : > { %v1528_v16 = vrot.slane %v1786_v60, %v1922_v7 }
 0x269   : > { %v1373_v30 = vsel %vm1372_vm11, %v1328_v22, %v1314_v19  ;;  %v1335_v31 = vadd.f32 %v1334_v20, %v1333_v10  ;;  %v1353_v11 = vrot.slane %v1352_v23, 2  ;;  %v1359_v32 = vadd.f32 %v1358_v27, %v1357_v2  ;;  %v1784_v2 = vld [vmem:[%s2256_s7 + $0x6] sm:$0x3] }
 0x26a   : > { %v1375_v34 = vsel %vm1374_vm12, %v1342_v29, %v1373_v30  ;;  %v1524_v10 = vrot.slane %v1786_v60, %v1919_v6  ;;  %v1466_v30 = vrot.slane %v1784_v2, %v1919_v6 }
 0x26b   : > { %v1378_v35 = vsel %vm1372_vm11, %v1335_v31, %v1321_v28  ;;  %v1354_v12 = vadd.f32 %v1353_v11, %v1352_v23  ;;  %v1360_v24 = vrot.slane %v1359_v32, 2  ;;  %v1470_v31 = vrot.slane %v1784_v2, %v1922_v7 }
 0x26c   : > { %v1379_v17 = vsel %vm1374_vm12, %v1349_v33, %v1378_v35  ;;  %v1782_v33 = vld [vmem:[%s2256_s7 + $0x2] sm:$0x3] }
 0x26d   : > { %v1355_v36 = vrot.slane %v1354_v12, 1  ;;  %v1361_v37 = vadd.f32 %v1360_v24, %v1359_v32 }
 0x26f   : > { %v1356_v38 = vadd.f32 %v1355_v36, %v1354_v12  ;;  %v1362_v8 = vrot.slane %v1361_v37, 1 }
 0x271   : > { %v1377_v26 = vsel %vm1376_vm13, %v1356_v38, %v1375_v34  ;;  %v1363_v14 = vadd.f32 %v1362_v8, %v1361_v37  ;;  %v1416_v37 = vrot.slane %v1782_v33, %v1919_v6  ;;  %v1420_v38 = vrot.slane %v1782_v33, %v1922_v7  ;;  %v1783_v8 = vld [vmem:[%s2256_s7 + $0x4] sm:$0x3] }
 0x272   : > { %1483 = vst [vmem:[#allocation2 + $0x48] sm:$0xf] %v1377_v26  ;;  %1535 = vrot.lane.b32.xlu0 %v1377_v26, %s1827_s12  ;;  %v1448_v13 = vrot.slane %v1783_v8, %v1922_v7 }
 0x273   : > { %v1380_v25 = vsel %vm1376_vm13, %v1363_v14, %v1379_v17 }
 0x274   : > { %1484 = vst [vmem:[#allocation2 + $0x28] sm:$0xf] %v1380_v25  ;;  %1537 = vrot.lane.b32.xlu1 %v1380_v25, %s1827_s12 }
 0x276   : > { %1563 = vrot.lane.b32.xlu0 %v1377_v26, %s1826_s11 }
 0x278   : > { %1565 = vrot.lane.b32.xlu1 %v1380_v25, %s1826_s11  ;;  %s1796_s11 = sshll.u32 %s2259_s28, 4 }
 0x27a   : > { %1485 = vrot.lane.b32.xlu0 %v1377_v26, %s1828_s13 }
 0x27c   : > { %1487 = vrot.lane.b32.xlu1 %v1380_v25, %s1828_s13 }
 0x27e   : > { %1513 = vrot.lane.b32.xlu0 %v1377_v26, %s1829_s14 }
 0x280   : > { %1515 = vrot.lane.b32.xlu1 %v1380_v25, %s1829_s14  ;;  %s325_s14 = scalar_lea.vmem %s2257_s8, %s1796_s11 }
 0x282   : > { %1455 = vrot.lane.b32.xlu0 %v1377_v26, %s1830_s15 }
 0x284   : > { %1457 = vrot.lane.b32.xlu1 %v1380_v25, %s1830_s15 }
 0x286   : > { %1405 = vrot.lane.b32.xlu0 %v1377_v26, %s1831_s16 }
 0x288   : > { %1407 = vrot.lane.b32.xlu1 %v1380_v25, %s1831_s16 }
 0x28a   : > { %1433 = vrot.lane.b32.xlu0 %v1377_v26, %s1832_s17 }
 0x28c   : > { %1435 = vrot.lane.b32.xlu1 %v1380_v25, %s1832_s17 }
 0x28e   : > { %1383 = vrot.lane.b32.xlu0 %v1377_v26, %s1834_s18 }
 0x290   : > { %1385 = vrot.lane.b32.xlu1 %v1380_v25, %s1834_s18 }
 0x292   : > { %1597 = vperm.xlu0 %1816, %v328_v18  }
 0x2e4   : > { %v1536_v41 = vpop.permute.xlu0 %1535 }
 0x2e6   : > { %v1538_v42 = vpop.permute.xlu1 %1537 }
 0x2e7   : > { %v1539_v43 = vsel %vm509_vm2, %v1536_v41, %v1538_v42  ;;  %v1540_v44 = vsel %vm509_vm2, %v1538_v42, %v1536_v41 }
 0x2e8   : > { %v1553_v45 = vmul.f32 %v1546_v15, %v1539_v43  ;;  %v1554_v46 = vmul.f32 %v1550_v9, %v1540_v44  ;;  %v1564_v47 = vpop.permute.xlu0 %1563  ;;  %v1444_v9 = vrot.slane %v1783_v8, %v1919_v6  ;;  %v1389_v44 = vld [vmem:[%s2256_s7] sm:$0x3] }
 0x2ea   : > { %v1557_v51 = vrot.slane %v1553_v45, 4  ;;  %v1558_v52 = vrot.slane %v1554_v46, 4  ;;  %v1566_v53 = vpop.permute.xlu1 %1565 }
 0x2eb   : > { %v1567_v54 = vsel %vm539_vm0, %v1564_v47, %v1566_v53  ;;  %v1568_v55 = vsel %vm539_vm0, %v1566_v53, %v1564_v47 }
 0x2ec   : > { %1561 = vst [vmem:[#allocation2 + $0x8] sm:$0xf0] %v1557_v51  ;;  %1562 = vst [vmem:[#allocation2 + $0x20] sm:$0xf0] %v1558_v52  ;;  %v1581_v56 = vmul.f32 %v1574_v48, %v1567_v54  ;;  %v1582_v57 = vmul.f32 %v1578_v49, %v1568_v55  ;;  %v1486_v4 = vpop.permute.xlu0 %1485  ;;  %v1394_v54 = vrot.slane %v1389_v44, %v1919_v6 }
 0x2ed   : > { %v1398_v55 = vrot.slane %v1389_v44, %v1922_v7 }
 0x2ee   : > { %1583 = vst [vmem:[#allocation2 + $0x40] sm:$0xf] %v1581_v56  ;;  %1584 = vst [vmem:[#allocation2 + $0x38] sm:$0xf] %v1582_v57  ;;  %v1488_v61 = vpop.permute.xlu1 %1487 }
 0x2ef   : > { %v1489_v62 = vsel %vm455_vm1, %v1486_v4, %v1488_v61  ;;  %v1490_v63 = vsel %vm455_vm1, %v1488_v61, %v1486_v4 }
 0x2f0   : > { %v1503_v0 = vmul.f32 %v1496_v58, %v1489_v62  ;;  %v1504_v1 = vmul.f32 %v1500_v59, %v1490_v63  ;;  %v1514_v3 = vpop.permute.xlu0 %1513  ;;  %v327_v63 = vld [vmem:[%s2252_s3] sm:$0xff] }
 0x2f2   : > { %v1507_v19 = vrot.slane %v1503_v0, 4  ;;  %v1508_v21 = vrot.slane %v1504_v1, 4  ;;  %v1516_v22 = vpop.permute.xlu1 %1515 }
 0x2f3   : > { %v1517_v20 = vsel %vm485_vm3, %v1514_v3, %v1516_v22  ;;  %v1518_v23 = vsel %vm485_vm3, %v1516_v22, %v1514_v3 }
 0x2f4   : > { %1511 = vst [vmem:[#allocation2 + $0x48] sm:$0xf0] %v1507_v19  ;;  %1512 = vst [vmem:[#allocation2 + $0x28] sm:$0xf0] %v1508_v21  ;;  %v1531_v27 = vmul.f32 %v1524_v10, %v1517_v20  ;;  %v1532_v28 = vmul.f32 %v1528_v16, %v1518_v23  ;;  %v1456_v29 = vpop.permute.xlu0 %1455 }
 0x2f5   : > { %v1594_v11 = vld [vmem:[#allocation2 + $0x38] sm:$0xf]  ;;  %v1593_v32 = vld [vmem:[#allocation2 + $0x40] sm:$0xf] }
 0x2f6   : > { %1533 = vst [vmem:[#allocation2 + $0x8] sm:$0xf] %v1531_v27  ;;  %1534 = vst [vmem:[#allocation2 + $0x20] sm:$0xf] %v1532_v28  ;;  %1789 = vmatprep.subr.msk.mxu0 %vm573_vm4, %v1594_v11  ;;  %v1458_v34 = vpop.permute.xlu1 %1457 }
 0x2f7   : > { %v1459_v35 = vsel %vm423_vm5, %v1456_v29, %v1458_v34  ;;  %v1460_v12 = vsel %vm423_vm5, %v1458_v34, %v1456_v29  ;;  %1790 = vmatpush1.msk.msra.mxu0 %vm573_vm4, %v1593_v32 }
 0x2f8   : > { %v1473_v24 = vmul.f32 %v1466_v30, %v1460_v12  ;;  %v1474_v17 = vmul.f32 %v1470_v31, %v1459_v35  ;;  %v1406_v36 = vpop.permute.xlu0 %1405 }
 0x2fa   : > { %v1477_v26 = vrot.slane %v1473_v24, 4  ;;  %v1478_v14 = vrot.slane %v1474_v17, 4  ;;  %v1408_v25 = vpop.permute.xlu1 %1407 }
 0x2fb   : > { %v1409_v18 = vsel %vm369_vm6, %v1406_v36, %v1408_v25  ;;  %v1410_v39 = vsel %vm369_vm6, %v1408_v25, %v1406_v36  ;;  %v1590_v50 = vld [vmem:[#allocation2 + $0x28] sm:$0xff] }
 0x2fc   : > { %1481 = vst [vmem:[#allocation2 + $0x18] sm:$0xf0] %v1477_v26  ;;  %1482 = vst [vmem:[#allocation2 + $0x10] sm:$0xf0] %v1478_v14  ;;  %v1423_v40 = vmul.f32 %v1416_v37, %v1410_v39  ;;  %v1424_v41 = vmul.f32 %v1420_v38, %v1409_v18  ;;  %v1434_v15 = vpop.permute.xlu0 %1433  ;;  %v1589_v53 = vld [vmem:[#allocation2 + $0x48] sm:$0xff] }
 0x2fd   : > { %v1592_v42 = vld [vmem:[#allocation2 + $0x20] sm:$0xff]  ;;  %v1591_v43 = vld [vmem:[#allocation2 + $0x8] sm:$0xff] }
 0x2fe   : > { %v1427_v45 = vrot.slane %v1423_v40, 4  ;;  %v1428_v46 = vrot.slane %v1424_v41, 4  ;;  %1633 = vmatprep.subr.mxu0 %v1592_v42  ;;  %v1436_v47 = vpop.permute.xlu1 %1435 }
 0x2ff   : > { %v1437_v48 = vsel %vm399_vm7, %v1434_v15, %v1436_v47  ;;  %v1438_v49 = vsel %vm399_vm7, %v1436_v47, %v1434_v15  ;;  %1634 = vmatpush1.msra.mxu0 %v1591_v43 }
 0x300   : > { %1431 = vst [vmem:[#allocation2 + $0x30] sm:$0xf0] %v1427_v45  ;;  %1432 = vst [vmem:[#allocation2] sm:$0xf0] %v1428_v46  ;;  %v1451_v51 = vmul.f32 %v1444_v9, %v1438_v49  ;;  %v1452_v52 = vmul.f32 %v1448_v13, %v1437_v48  ;;  %1635 = vmatprep.subr.mxu0 %v1590_v50  ;;  %v1384_v56 = vpop.permute.xlu0 %1383 }
 0x301   : > { %1636 = vmatpush1.msra.mxu0 %v1589_v53 }
 0x302   : > { %1453 = vst [vmem:[#allocation2 + $0x18] sm:$0xf] %v1451_v51  ;;  %1454 = vst [vmem:[#allocation2 + $0x10] sm:$0xf] %v1452_v52  ;;  %v1386_v57 = vpop.permute.xlu1 %1385 }
 0x303   : > { %v1387_v4 = vsel %vm346_vm8, %v1384_v56, %v1386_v57  ;;  %v1388_v58 = vsel %vm346_vm8, %v1386_v57, %v1384_v56 }
 0x304   : > { %v1401_v59 = vmul.f32 %v1394_v54, %v1388_v58  ;;  %v1402_v60 = vmul.f32 %v1398_v55, %v1387_v4 }
 0x306   : > { %1403 = vst [vmem:[#allocation2 + $0x30] sm:$0xf] %v1401_v59  ;;  %1404 = vst [vmem:[#allocation2] sm:$0xf] %v1402_v60 }
 0x309   : > { %v1588_v61 = vld [vmem:[#allocation2 + $0x10] sm:$0xff]  ;;  %v1587_v6 = vld [vmem:[#allocation2 + $0x18] sm:$0xff] }
 0x30a   : > { %1637 = vmatprep.subr.mxu0 %v1588_v61 }
 0x30b   : > { %1638 = vmatpush1.msra.mxu0 %v1587_v6 }
 0x30d   : > { %v1586_v7 = vld [vmem:[#allocation2] sm:$0xff]  ;;  %v1585_v62 = vld [vmem:[#allocation2 + $0x30] sm:$0xff]  ;;  %v1598_v5 = vpop.permute.xlu0 %1597 }
 0x30e   : > { %1639 = vmatprep.subr.mxu0 %v1586_v7 }
 0x30f   : > { %1640 = vmatpush1.msra.mxu0 %v1585_v62 }
 0x310   : > { %1791 = vmatmul.mubr.msk.f32.vlgmr.msra.gmra.mxu0 %vm569_vm9, %v327_v63 }
 0x3d0   : > { %v1675_v0 = vpop.f32.mrf.mxu0 }
 0x3d1   : > { %v1676_v1 = vadd.f32 %v1675_v0, %v1598_v5 }
 0x3d2   : > { %v1677_v3 = vpop.f32.mrf.mxu0 }
 0x3d3   : > { %1680 = vst [vmem:[%s325_s14] sm:$0xff] %v1676_v1  ;;  %v1678_v10 = vadd.f32 %v1677_v3, %v1598_v5 }
 0x3d5   : > { %1681 = vst [vmem:[%s325_s14 + $0x8] sm:$0xff] %v1678_v10 }
 0x3d6 PF: > { %s18_s27 = sadd.s32 1, %s1824_s27  }
 0x3d7   : > { %p15_p4 = scmp.ge.s32.totalorder %s18_s27, 4  }
 0x3d9   :  { %17 = sbr.rel (!%p15_p4) target bundleno = 1 (0x1), region = 92 }

</bundles_post_ra>
